<compile_context>
chip_gen: v5e
topology: v5e:2x2
jax: 0.10.0
libtpu: 0.0.40
codegen_flags: <defaults>
</compile_context>

<pallas_src>
import math
import functools

import jax
import jax.numpy as jnp
from jax.experimental import pallas as pl
from jax.experimental.pallas import tpu as pltpu


def _mha_flash_kernel(h_q_ref, h_kv_ref, wq_ref, wkv_ref, wo_ref, gamma_ref, beta_ref,
                      o_ref, q_scr, m_scr, l_scr, acc_scr, *, n_head, d_head, eps):
    ki = pl.program_id(1)
    n_kv = pl.num_programs(1)

    tq, B, Dm = h_q_ref.shape
    tk = h_kv_ref.shape[0]
    H, Dh = n_head, d_head
    HD = H * Dh
    cdt = h_q_ref.dtype            # MXU input dtype follows the activations (bf16 or f32)

    # ---- once per q tile: project q (scale pre-folded into Wq) & init softmax state ----
    @pl.when(ki == 0)
    def _init():
        hq = h_q_ref[...].reshape(tq * B, Dm)                              # flatten rows
        q = jnp.dot(hq, wq_ref[...], preferred_element_type=jnp.float32)  # [tq*B, HD]
        q = q.reshape(tq, B, H, Dh).transpose(1, 2, 0, 3).reshape(B * H, tq, Dh)
        q_scr[...] = q
        m_scr[...] = jnp.full(m_scr.shape, -jnp.inf, dtype=m_scr.dtype)
        l_scr[...] = jnp.zeros(l_scr.shape, l_scr.dtype)
        acc_scr[...] = jnp.zeros(acc_scr.shape, acc_scr.dtype)

    # ---- per kv tile: fused K|V projection ----
    hk = h_kv_ref[...].reshape(tk * B, Dm)
    kv = jnp.dot(hk, wkv_ref[...], preferred_element_type=jnp.float32)     # [tk*B, 2*HD]
    k = kv[:, :HD].reshape(tk, B, H, Dh).transpose(1, 2, 0, 3).reshape(B * H, tk, Dh)
    v = kv[:, HD:].reshape(tk, B, H, Dh).transpose(1, 2, 0, 3).reshape(B * H, tk, Dh)

    # ---- batched scores over g = (batch, head); contraction on Dh (no explicit .T) ----
    s = jnp.einsum('gid,gjd->gij', q_scr[...].astype(cdt), k.astype(cdt),
                   preferred_element_type=jnp.float32)                     # [G, tq, tk]

    # ---- online softmax update (f32 statistics) ----
    m_new = jnp.maximum(m_scr[...], jnp.max(s, axis=-1, keepdims=True))
    alpha = jnp.exp(m_scr[...] - m_new)
    p = jnp.exp(s - m_new)
    l_scr[...] = alpha * l_scr[...] + jnp.sum(p, axis=-1, keepdims=True)
    acc_scr[...] = alpha * acc_scr[...] + jnp.einsum(
        'gij,gjd->gid', p.astype(cdt), v.astype(cdt),
        preferred_element_type=jnp.float32)
    m_scr[...] = m_new

    # ---- last kv tile: normalize, output projection, residual + LayerNorm ----
    @pl.when(ki == n_kv - 1)
    def _finalize():
        attn = acc_scr[...] * pl.reciprocal(l_scr[...], approx=True)       # [G, tq, Dh]
        attn = attn.reshape(B, H, tq, Dh).transpose(2, 0, 1, 3).reshape(tq * B, HD)
        out = jnp.dot(attn.astype(cdt), wo_ref[...],
                      preferred_element_type=jnp.float32)                  # [tq*B, Dm]
        x = h_q_ref[...].reshape(tq * B, Dm).astype(jnp.float32) + out
        mean = jnp.mean(x, axis=-1, keepdims=True)
        xc = x - mean
        var = jnp.mean(xc * xc, axis=-1, keepdims=True)
        y = xc * jax.lax.rsqrt(var + eps) * gamma_ref[0] + beta_ref[0]
        o_ref[...] = y.reshape(tq, B, Dm).astype(o_ref.dtype)


def _pick_tile(n, pref):
    """Largest tile <= pref that divides n (128-aligned preferred)."""
    pref = min(pref, n)
    if n % pref == 0:
        return pref
    for t in (256, 128, 64, 32, 16, 8):
        if t <= pref and n % t == 0:
            return t
    # TODO(synk): pad/mask ragged sequence tails instead of falling back to one block.
    return n


def multi_head_attn(h, wq, wkv, wo, gamma, beta, *, n_head, d_head, eps=1e-5,
                    q_tile=128, kv_tile=128):
    """h: [qlen, bsz, d_model] (PyTorch seq-major layout). Returns the same layout.

    Weights stored [in, out] (transposed nn.Linear.weight), no bias.
    wkv = concat(Wk | Wv) along the output dim, matching the module's kv_net.
    """
    qlen, bsz, d_model = h.shape
    HD = n_head * d_head
    scale = 1.0 / math.sqrt(d_head)

    tq = _pick_tile(qlen, q_tile)
    tk = _pick_tile(qlen, kv_tile)
    n_q, n_kv = qlen // tq, qlen // tk

    # Fold the softmax scale into Wq (O(Dm*HD) once, instead of scaling [L,L] scores).
    wq_s = (wq * scale).astype(wq.dtype)
    gamma2 = gamma.reshape(1, d_model)
    beta2 = beta.reshape(1, d_model)

    kernel = functools.partial(_mha_flash_kernel, n_head=n_head, d_head=d_head, eps=eps)

    itemsize = h.dtype.itemsize
    flops = (2 * qlen * bsz * d_model * 3 * HD          # fused Q and K|V projections
             + 4 * bsz * n_head * qlen * qlen * d_head  # QK^T + PV
             + 2 * qlen * bsz * HD * d_model)           # output projection
    bytes_accessed = int(2 * h.size * itemsize                       # h read as q- and kv-stream
                         + qlen * bsz * d_model * itemsize           # output
                         + (wq.size + wkv.size + wo.size + 2 * d_model) * itemsize)
    cost = pl.CostEstimate(flops=int(flops),
                           transcendentals=int(bsz * n_head * qlen * qlen),
                           bytes_accessed=bytes_accessed)

    return pl.pallas_call(
        kernel,
        out_shape=jax.ShapeDtypeStruct((qlen, bsz, d_model), h.dtype),
        grid_spec=pltpu.PrefetchScalarGridSpec(
            num_scalar_prefetch=0,
            grid=(n_q, n_kv),
            in_specs=[
                pl.BlockSpec((tq, bsz, d_model), lambda qi, ki: (qi, 0, 0)),  # h (q rows)
                pl.BlockSpec((tk, bsz, d_model), lambda qi, ki: (ki, 0, 0)),  # h (kv rows)
                pl.BlockSpec((d_model, HD), lambda qi, ki: (0, 0)),           # Wq (scale folded)
                pl.BlockSpec((d_model, 2 * HD), lambda qi, ki: (0, 0)),       # Wkv fused
                pl.BlockSpec((HD, d_model), lambda qi, ki: (0, 0)),           # Wo
                pl.BlockSpec((1, d_model), lambda qi, ki: (0, 0)),            # gamma
                pl.BlockSpec((1, d_model), lambda qi, ki: (0, 0)),            # beta
            ],
            out_specs=pl.BlockSpec((tq, bsz, d_model), lambda qi, ki: (qi, 0, 0)),
            scratch_shapes=[
                pltpu.VMEM((bsz * n_head, tq, d_head), jnp.float32),  # q (scaled)
                pltpu.VMEM((bsz * n_head, tq, 1), jnp.float32),       # running max m
                pltpu.VMEM((bsz * n_head, tq, 1), jnp.float32),       # running sum l
                pltpu.VMEM((bsz * n_head, tq, d_head), jnp.float32),  # acc (P @ V)
            ],
        ),
        compiler_params=pltpu.CompilerParams(
            dimension_semantics=("parallel", "arbitrary"),
            vmem_limit_bytes=48 * 1024 * 1024),   # headroom above default, < 64 MiB (v7x)
        cost_estimate=cost,
    )(h, h, wq_s, wkv, wo, gamma2, beta2)


def _reference(h, wq, wkv, wo, gamma, beta, n_head, d_head, eps=1e-5):
    """Pure-JAX reference mirroring the PyTorch forward (mems=None, mask=None)."""
    qlen, bsz, d_model = h.shape
    HD = n_head * d_head
    q = jnp.einsum('ibm,mh->ibh', h, wq).reshape(qlen, bsz, n_head, d_head)
    kv = jnp.einsum('ibm,mh->ibh', h, wkv)
    k = kv[..., :HD].reshape(qlen, bsz, n_head, d_head)
    v = kv[..., HD:].reshape(qlen, bsz, n_head, d_head)
    score = jnp.einsum('ibnd,jbnd->ijbn', q, k) * (1.0 / math.sqrt(d_head))
    prob = jax.nn.softmax(score, axis=1)
    vec = jnp.einsum('ijbn,jbnd->ibnd', prob, v).reshape(qlen, bsz, HD)
    attn_out = jnp.einsum('ibh,hm->ibm', vec, wo)
    x = h + attn_out
    mean = x.mean(-1, keepdims=True)
    var = ((x - mean) ** 2).mean(-1, keepdims=True)
    return (x - mean) / jnp.sqrt(var + eps) * gamma + beta


if __name__ == "__main__":
    # Small shapes consistent with the module.
    n_head, d_head, d_model = 4, 8, 32
    qlen, bsz = 16, 2
    HD = n_head * d_head

    key = jax.random.PRNGKey(0)
    k_h, k_q, k_kv, k_o = jax.random.split(key, 4)

    h = jax.random.normal(k_h, (qlen, bsz, d_model), dtype=jnp.float32)
    wq = jax.random.normal(k_q, (d_model, HD), dtype=jnp.float32) * 0.1
    wkv = jax.random.normal(k_kv, (d_model, 2 * HD), dtype=jnp.float32) * 0.1
    wo = jax.random.normal(k_o, (HD, d_model), dtype=jnp.float32) * 0.1
    gamma = jnp.ones((d_model,), dtype=jnp.float32)
    beta = jnp.zeros((d_model,), dtype=jnp.float32)

    # Small tiles so the (q_tiles, kv_tiles) grid and online-softmax path are exercised.
    out = multi_head_attn(h, wq, wkv, wo, gamma, beta,
                          n_head=n_head, d_head=d_head,
                          q_tile=8, kv_tile=8)
    out = jax.block_until_ready(out)

    ref = _reference(h, wq, wkv, wo, gamma, beta, n_head, d_head)
    assert out.shape == (qlen, bsz, d_model)
    assert jnp.allclose(out, ref, atol=2e-3, rtol=2e-3), "mismatch vs reference"

    print("KERNEL_OK")
</pallas_src>

<mosaic_0001>
module attributes {stable_mosaic.version = 11 : i64} {
  func.func @_mha_flash_kernel(%arg0: i32, %arg1: i32, %arg2: memref<8x2x32xf32, #tpu.memory_space<vmem>>, %arg3: memref<8x2x32xf32, #tpu.memory_space<vmem>>, %arg4: memref<32x32xf32, #tpu.memory_space<vmem>>, %arg5: memref<32x64xf32, #tpu.memory_space<vmem>>, %arg6: memref<32x32xf32, #tpu.memory_space<vmem>>, %arg7: memref<1x32xf32, #tpu.memory_space<vmem>>, %arg8: memref<1x32xf32, #tpu.memory_space<vmem>>, %arg9: memref<8x2x32xf32, #tpu.memory_space<vmem>>, %arg10: memref<8x8x8xf32, #tpu.memory_space<vmem>>, %arg11: memref<8x8x1xf32, #tpu.memory_space<vmem>>, %arg12: memref<8x8x1xf32, #tpu.memory_space<vmem>>, %arg13: memref<8x8x8xf32, #tpu.memory_space<vmem>>) attributes {dimension_semantics = [#tpu.dimension_semantics<parallel>, #tpu.dimension_semantics<arbitrary>], iteration_bounds = array<i64: 2, 2>, scalar_prefetch = 0 : i64, scratch_operands = 4 : i64, tpu.core_type = #tpu.core_type<tc>, window_params = [{transform_indices = @transform_0, window_bounds = array<i64: 8, 2, 32>}, {transform_indices = @transform_1, window_bounds = array<i64: 8, 2, 32>}, {pipeline_mode = #tpu.pipeline_mode<synchronous>, transform_indices = @transform_2, window_bounds = array<i64: 32, 32>}, {pipeline_mode = #tpu.pipeline_mode<synchronous>, transform_indices = @transform_3, window_bounds = array<i64: 32, 64>}, {pipeline_mode = #tpu.pipeline_mode<synchronous>, transform_indices = @transform_4, window_bounds = array<i64: 32, 32>}, {pipeline_mode = #tpu.pipeline_mode<synchronous>, transform_indices = @transform_5, window_bounds = array<i64: 1, 32>}, {pipeline_mode = #tpu.pipeline_mode<synchronous>, transform_indices = @transform_6, window_bounds = array<i64: 1, 32>}, {transform_indices = @transform_7, window_bounds = array<i64: 8, 2, 32>}]} {
    %c0_i32 = arith.constant 0 : i32
    %0 = arith.cmpi eq, %arg1, %c0_i32 : i32
    %1 = arith.extui %0 : i1 to i32
    %c0_i32_0 = arith.constant 0 : i32
    %2 = arith.cmpi ne, %1, %c0_i32_0 : i32
    scf.if %2 {
      %c0_34 = arith.constant 0 : index
      %c0_35 = arith.constant 0 : index
      %c0_36 = arith.constant 0 : index
      %43 = vector.load %arg2[%c0_34, %c0_35, %c0_36] : memref<8x2x32xf32, #tpu.memory_space<vmem>>, vector<8x2x32xf32>
      %44 = vector.shape_cast %43 : vector<8x2x32xf32> to vector<16x32xf32>
      %c0_37 = arith.constant 0 : index
      %c0_38 = arith.constant 0 : index
      %45 = vector.load %arg4[%c0_37, %c0_38] : memref<32x32xf32, #tpu.memory_space<vmem>>, vector<32x32xf32>
      %cst_39 = arith.constant dense<0.000000e+00> : vector<16x32xf32>
      %46 = tpu.matmul %44, %45, %cst_39 {dimension_numbers = #tpu.dot_dimension_numbers<[1], [0], [0], [1], [0, 0, 1, 1], [], []>} : vector<16x32xf32>, vector<32x32xf32>, vector<16x32xf32> -> vector<16x32xf32>
      %47 = vector.shape_cast %46 : vector<16x32xf32> to vector<8x2x4x8xf32>
      %48 = tpu.transpose %47, [1, 2, 0, 3] : vector<8x2x4x8xf32> -> vector<2x4x8x8xf32>
      %49 = vector.shape_cast %48 : vector<2x4x8x8xf32> to vector<8x8x8xf32>
      %c0_40 = arith.constant 0 : index
      %c0_41 = arith.constant 0 : index
      %c0_42 = arith.constant 0 : index
      %50 = vector.load %arg10[%c0_40, %c0_41, %c0_42] : memref<8x8x8xf32, #tpu.memory_space<vmem>>, vector<8x8x8xf32>
      tpu.vector_store %arg10[%c0_40, %c0_41, %c0_42], %49 {strides = array<i32>} : memref<8x8x8xf32, #tpu.memory_space<vmem>>, vector<8x8x8xf32>,
      %cst_43 = arith.constant 0xFF800000 : f32
      %51 = vector.broadcast %cst_43 : f32 to vector<8x8x1xf32>
      %c0_44 = arith.constant 0 : index
      %c0_45 = arith.constant 0 : index
      %c0_46 = arith.constant 0 : index
      %52 = vector.load %arg11[%c0_44, %c0_45, %c0_46] : memref<8x8x1xf32, #tpu.memory_space<vmem>>, vector<8x8x1xf32>
      tpu.vector_store %arg11[%c0_44, %c0_45, %c0_46], %51 {strides = array<i32>} : memref<8x8x1xf32, #tpu.memory_space<vmem>>, vector<8x8x1xf32>,
      %cst_47 = arith.constant 0.000000e+00 : f32
      %53 = vector.broadcast %cst_47 : f32 to vector<8x8x1xf32>
      %c0_48 = arith.constant 0 : index
      %c0_49 = arith.constant 0 : index
      %c0_50 = arith.constant 0 : index
      %54 = vector.load %arg12[%c0_48, %c0_49, %c0_50] : memref<8x8x1xf32, #tpu.memory_space<vmem>>, vector<8x8x1xf32>
      tpu.vector_store %arg12[%c0_48, %c0_49, %c0_50], %53 {strides = array<i32>} : memref<8x8x1xf32, #tpu.memory_space<vmem>>, vector<8x8x1xf32>,
      %cst_51 = arith.constant 0.000000e+00 : f32
      %55 = vector.broadcast %cst_51 : f32 to vector<8x8x8xf32>
      %c0_52 = arith.constant 0 : index
      %c0_53 = arith.constant 0 : index
      %c0_54 = arith.constant 0 : index
      %56 = vector.load %arg13[%c0_52, %c0_53, %c0_54] : memref<8x8x8xf32, #tpu.memory_space<vmem>>, vector<8x8x8xf32>
      tpu.vector_store %arg13[%c0_52, %c0_53, %c0_54], %55 {strides = array<i32>} : memref<8x8x8xf32, #tpu.memory_space<vmem>>, vector<8x8x8xf32>,
    } else {
    }
    %c0 = arith.constant 0 : index
    %c0_1 = arith.constant 0 : index
    %c0_2 = arith.constant 0 : index
    %3 = vector.load %arg3[%c0, %c0_1, %c0_2] : memref<8x2x32xf32, #tpu.memory_space<vmem>>, vector<8x2x32xf32>
    %4 = vector.shape_cast %3 : vector<8x2x32xf32> to vector<16x32xf32>
    %c0_3 = arith.constant 0 : index
    %c0_4 = arith.constant 0 : index
    %5 = vector.load %arg5[%c0_3, %c0_4] : memref<32x64xf32, #tpu.memory_space<vmem>>, vector<32x64xf32>
    %cst = arith.constant dense<0.000000e+00> : vector<16x64xf32>
    %6 = tpu.matmul %4, %5, %cst {dimension_numbers = #tpu.dot_dimension_numbers<[1], [0], [0], [1], [0, 0, 1, 1], [], []>} : vector<16x32xf32>, vector<32x64xf32>, vector<16x64xf32> -> vector<16x64xf32>
    %7 = vector.extract_strided_slice %6 {offsets = [0, 0], sizes = [16, 32], strides = [1, 1]} : vector<16x64xf32> to vector<16x32xf32>
    %8 = vector.shape_cast %7 : vector<16x32xf32> to vector<8x2x4x8xf32>
    %9 = tpu.transpose %8, [1, 2, 0, 3] : vector<8x2x4x8xf32> -> vector<2x4x8x8xf32>
    %10 = vector.shape_cast %9 : vector<2x4x8x8xf32> to vector<8x8x8xf32>
    %11 = vector.extract_strided_slice %6 {offsets = [0, 32], sizes = [16, 32], strides = [1, 1]} : vector<16x64xf32> to vector<16x32xf32>
    %12 = vector.shape_cast %11 : vector<16x32xf32> to vector<8x2x4x8xf32>
    %13 = tpu.transpose %12, [1, 2, 0, 3] : vector<8x2x4x8xf32> -> vector<2x4x8x8xf32>
    %14 = vector.shape_cast %13 : vector<2x4x8x8xf32> to vector<8x8x8xf32>
    %c0_5 = arith.constant 0 : index
    %c0_6 = arith.constant 0 : index
    %c0_7 = arith.constant 0 : index
    %15 = vector.load %arg10[%c0_5, %c0_6, %c0_7] : memref<8x8x8xf32, #tpu.memory_space<vmem>>, vector<8x8x8xf32>
    "tpu.trace_start"() <{level = 10 : i32, message = "gid,gjd->gij"}> : () -> ()
    %cst_8 = arith.constant dense<0.000000e+00> : vector<8x8x8xf32>
    %16 = tpu.matmul %15, %10, %cst_8 {dimension_numbers = #tpu.dot_dimension_numbers<[2], [2], [1], [1], [0, 0, 0, 1, 1, 1], [0], [0]>} : vector<8x8x8xf32>, vector<8x8x8xf32>, vector<8x8x8xf32> -> vector<8x8x8xf32>
    "tpu.trace_stop"() : () -> ()
    %c0_9 = arith.constant 0 : index
    %c0_10 = arith.constant 0 : index
    %c0_11 = arith.constant 0 : index
    %17 = vector.load %arg11[%c0_9, %c0_10, %c0_11] : memref<8x8x1xf32, #tpu.memory_space<vmem>>, vector<8x8x1xf32>
    %cst_12 = arith.constant dense<0xFF800000> : vector<8x8xf32>
    %18 = vector.multi_reduction <maximumf>, %16, %cst_12 [2] : vector<8x8x8xf32> to vector<8x8xf32>
    %19 = vector.shape_cast %18 : vector<8x8xf32> to vector<8x8x1xf32>
    %20 = arith.maximumf %17, %19 : vector<8x8x1xf32>
    %c0_13 = arith.constant 0 : index
    %c0_14 = arith.constant 0 : index
    %c0_15 = arith.constant 0 : index
    %21 = vector.load %arg11[%c0_13, %c0_14, %c0_15] : memref<8x8x1xf32, #tpu.memory_space<vmem>>, vector<8x8x1xf32>
    %22 = arith.subf %21, %20 : vector<8x8x1xf32>
    %23 = math.exp %22 : vector<8x8x1xf32>
    %24 = vector.broadcast %20 : vector<8x8x1xf32> to vector<8x8x8xf32>
    %25 = arith.subf %16, %24 : vector<8x8x8xf32>
    %26 = math.exp %25 : vector<8x8x8xf32>
    %c0_16 = arith.constant 0 : index
    %c0_17 = arith.constant 0 : index
    %c0_18 = arith.constant 0 : index
    %27 = vector.load %arg12[%c0_16, %c0_17, %c0_18] : memref<8x8x1xf32, #tpu.memory_space<vmem>>, vector<8x8x1xf32>
    %28 = arith.mulf %23, %27 : vector<8x8x1xf32>
    %cst_19 = arith.constant dense<0.000000e+00> : vector<8x8xf32>
    %29 = vector.multi_reduction <add>, %26, %cst_19 [2] : vector<8x8x8xf32> to vector<8x8xf32>
    %30 = vector.shape_cast %29 : vector<8x8xf32> to vector<8x8x1xf32>
    %31 = arith.addf %28, %30 : vector<8x8x1xf32>
    %c0_20 = arith.constant 0 : index
    %c0_21 = arith.constant 0 : index
    %c0_22 = arith.constant 0 : index
    %32 = vector.load %arg12[%c0_20, %c0_21, %c0_22] : memref<8x8x1xf32, #tpu.memory_space<vmem>>, vector<8x8x1xf32>
    tpu.vector_store %arg12[%c0_20, %c0_21, %c0_22], %31 {strides = array<i32>} : memref<8x8x1xf32, #tpu.memory_space<vmem>>, vector<8x8x1xf32>,
    %c0_23 = arith.constant 0 : index
    %c0_24 = arith.constant 0 : index
    %c0_25 = arith.constant 0 : index
    %33 = vector.load %arg13[%c0_23, %c0_24, %c0_25] : memref<8x8x8xf32, #tpu.memory_space<vmem>>, vector<8x8x8xf32>
    %34 = vector.broadcast %23 : vector<8x8x1xf32> to vector<8x8x8xf32>
    %35 = arith.mulf %34, %33 : vector<8x8x8xf32>
    "tpu.trace_start"() <{level = 10 : i32, message = "gij,gjd->gid"}> : () -> ()
    %cst_26 = arith.constant dense<0.000000e+00> : vector<8x8x8xf32>
    %36 = tpu.matmul %26, %14, %cst_26 {dimension_numbers = #tpu.dot_dimension_numbers<[2], [1], [1], [2], [0, 0, 0, 1, 1, 2], [0], [0]>} : vector<8x8x8xf32>, vector<8x8x8xf32>, vector<8x8x8xf32> -> vector<8x8x8xf32>
    "tpu.trace_stop"() : () -> ()
    %37 = arith.addf %35, %36 : vector<8x8x8xf32>
    %c0_27 = arith.constant 0 : index
    %c0_28 = arith.constant 0 : index
    %c0_29 = arith.constant 0 : index
    %38 = vector.load %arg13[%c0_27, %c0_28, %c0_29] : memref<8x8x8xf32, #tpu.memory_space<vmem>>, vector<8x8x8xf32>
    tpu.vector_store %arg13[%c0_27, %c0_28, %c0_29], %37 {strides = array<i32>} : memref<8x8x8xf32, #tpu.memory_space<vmem>>, vector<8x8x8xf32>,
    %c0_30 = arith.constant 0 : index
    %c0_31 = arith.constant 0 : index
    %c0_32 = arith.constant 0 : index
    %39 = vector.load %arg11[%c0_30, %c0_31, %c0_32] : memref<8x8x1xf32, #tpu.memory_space<vmem>>, vector<8x8x1xf32>
    tpu.vector_store %arg11[%c0_30, %c0_31, %c0_32], %20 {strides = array<i32>} : memref<8x8x1xf32, #tpu.memory_space<vmem>>, vector<8x8x1xf32>,
    %c1_i32 = arith.constant 1 : i32
    %40 = arith.cmpi eq, %arg1, %c1_i32 : i32
    %41 = arith.extui %40 : i1 to i32
    %c0_i32_33 = arith.constant 0 : i32
    %42 = arith.cmpi ne, %41, %c0_i32_33 : i32
    scf.if %42 {
      %c0_34 = arith.constant 0 : index
      %c0_35 = arith.constant 0 : index
      %c0_36 = arith.constant 0 : index
      %43 = vector.load %arg13[%c0_34, %c0_35, %c0_36] : memref<8x8x8xf32, #tpu.memory_space<vmem>>, vector<8x8x8xf32>
      %c0_37 = arith.constant 0 : index
      %c0_38 = arith.constant 0 : index
      %c0_39 = arith.constant 0 : index
      %44 = vector.load %arg12[%c0_37, %c0_38, %c0_39] : memref<8x8x1xf32, #tpu.memory_space<vmem>>, vector<8x8x1xf32>
      %45 = tpu.reciprocal %44 {approx = true} : vector<8x8x1xf32> -> vector<8x8x1xf32>
      %46 = vector.broadcast %45 : vector<8x8x1xf32> to vector<8x8x8xf32>
      %47 = arith.mulf %43, %46 : vector<8x8x8xf32>
      %48 = vector.shape_cast %47 : vector<8x8x8xf32> to vector<2x4x8x8xf32>
      %49 = tpu.transpose %48, [2, 0, 1, 3] : vector<2x4x8x8xf32> -> vector<8x2x4x8xf32>
      %50 = vector.shape_cast %49 : vector<8x2x4x8xf32> to vector<16x32xf32>
      %c0_40 = arith.constant 0 : index
      %c0_41 = arith.constant 0 : index
      %51 = vector.load %arg6[%c0_40, %c0_41] : memref<32x32xf32, #tpu.memory_space<vmem>>, vector<32x32xf32>
      %cst_42 = arith.constant dense<0.000000e+00> : vector<16x32xf32>
      %52 = tpu.matmul %50, %51, %cst_42 {dimension_numbers = #tpu.dot_dimension_numbers<[1], [0], [0], [1], [0, 0, 1, 1], [], []>} : vector<16x32xf32>, vector<32x32xf32>, vector<16x32xf32> -> vector<16x32xf32>
      %c0_43 = arith.constant 0 : index
      %c0_44 = arith.constant 0 : index
      %c0_45 = arith.constant 0 : index
      %53 = vector.load %arg2[%c0_43, %c0_44, %c0_45] : memref<8x2x32xf32, #tpu.memory_space<vmem>>, vector<8x2x32xf32>
      %54 = vector.shape_cast %53 : vector<8x2x32xf32> to vector<16x32xf32>
      %55 = arith.addf %54, %52 : vector<16x32xf32>
      %cst_46 = arith.constant dense<0.000000e+00> : vector<16xf32>
      %56 = vector.multi_reduction <add>, %55, %cst_46 [1] : vector<16x32xf32> to vector<16xf32>
      %57 = vector.shape_cast %56 : vector<16xf32> to vector<16x1xf32>
      %cst_47 = arith.constant 3.200000e+01 : f32
      %58 = vector.broadcast %cst_47 : f32 to vector<16x1xf32>
      %59 = arith.divf %57, %58 : vector<16x1xf32>
      %60 = vector.broadcast %59 : vector<16x1xf32> to vector<16x32xf32>
      %61 = arith.subf %55, %60 : vector<16x32xf32>
      %62 = arith.mulf %61, %61 : vector<16x32xf32>
      %cst_48 = arith.constant dense<0.000000e+00> : vector<16xf32>
      %63 = vector.multi_reduction <add>, %62, %cst_48 [1] : vector<16x32xf32> to vector<16xf32>
      %64 = vector.shape_cast %63 : vector<16xf32> to vector<16x1xf32>
      %cst_49 = arith.constant 3.200000e+01 : f32
      %65 = vector.broadcast %cst_49 : f32 to vector<16x1xf32>
      %66 = arith.divf %64, %65 : vector<16x1xf32>
      %cst_50 = arith.constant 9.99999974E-6 : f32
      %67 = vector.broadcast %cst_50 : f32 to vector<16x1xf32>
      %68 = arith.addf %66, %67 : vector<16x1xf32>
      %69 = math.rsqrt %68 : vector<16x1xf32>
      %70 = vector.broadcast %69 : vector<16x1xf32> to vector<16x32xf32>
      %71 = arith.mulf %61, %70 : vector<16x32xf32>
      %c0_51 = arith.constant 0 : index
      %c0_52 = arith.constant 0 : index
      %72 = vector.load %arg7[%c0_51, %c0_52] : memref<1x32xf32, #tpu.memory_space<vmem>>, vector<1x32xf32>
      %73 = vector.shape_cast %72 : vector<1x32xf32> to vector<32xf32>
      %74 = vector.shape_cast %73 : vector<32xf32> to vector<1x32xf32>
      %75 = vector.broadcast %74 : vector<1x32xf32> to vector<16x32xf32>
      %76 = arith.mulf %71, %75 : vector<16x32xf32>
      %c0_53 = arith.constant 0 : index
      %c0_54 = arith.constant 0 : index
      %77 = vector.load %arg8[%c0_53, %c0_54] : memref<1x32xf32, #tpu.memory_space<vmem>>, vector<1x32xf32>
      %78 = vector.shape_cast %77 : vector<1x32xf32> to vector<32xf32>
      %79 = vector.shape_cast %78 : vector<32xf32> to vector<1x32xf32>
      %80 = vector.broadcast %79 : vector<1x32xf32> to vector<16x32xf32>
      %81 = arith.addf %76, %80 : vector<16x32xf32>
      %82 = vector.shape_cast %81 : vector<16x32xf32> to vector<8x2x32xf32>
      %c0_55 = arith.constant 0 : index
      %c0_56 = arith.constant 0 : index
      %c0_57 = arith.constant 0 : index
      %83 = vector.load %arg9[%c0_55, %c0_56, %c0_57] : memref<8x2x32xf32, #tpu.memory_space<vmem>>, vector<8x2x32xf32>
      tpu.vector_store %arg9[%c0_55, %c0_56, %c0_57], %82 {strides = array<i32>} : memref<8x2x32xf32, #tpu.memory_space<vmem>>, vector<8x2x32xf32>,
    } else {
    }
    return
  }
  func.func @transform_0(%arg0: i32, %arg1: i32) -> (i32, i32, i32) {
    %c0_i32 = arith.constant 0 : i32
    %c0_i32_0 = arith.constant 0 : i32
    %c0_i32_1 = arith.constant 0 : i32
    return %arg0, %c0_i32, %c0_i32_0 : i32, i32, i32
  }
  func.func @transform_1(%arg0: i32, %arg1: i32) -> (i32, i32, i32) {
    %c0_i32 = arith.constant 0 : i32
    %c0_i32_0 = arith.constant 0 : i32
    %c0_i32_1 = arith.constant 0 : i32
    return %arg1, %c0_i32, %c0_i32_0 : i32, i32, i32
  }
  func.func @transform_2(%arg0: i32, %arg1: i32) -> (i32, i32) {
    %c0_i32 = arith.constant 0 : i32
    %c0_i32_0 = arith.constant 0 : i32
    %c0_i32_1 = arith.constant 0 : i32
    return %c0_i32, %c0_i32_0 : i32, i32
  }
  func.func @transform_3(%arg0: i32, %arg1: i32) -> (i32, i32) {
    %c0_i32 = arith.constant 0 : i32
    %c0_i32_0 = arith.constant 0 : i32
    %c0_i32_1 = arith.constant 0 : i32
    return %c0_i32, %c0_i32_0 : i32, i32
  }
  func.func @transform_4(%arg0: i32, %arg1: i32) -> (i32, i32) {
    %c0_i32 = arith.constant 0 : i32
    %c0_i32_0 = arith.constant 0 : i32
    %c0_i32_1 = arith.constant 0 : i32
    return %c0_i32, %c0_i32_0 : i32, i32
  }
  func.func @transform_5(%arg0: i32, %arg1: i32) -> (i32, i32) {
    %c0_i32 = arith.constant 0 : i32
    %c0_i32_0 = arith.constant 0 : i32
    %c0_i32_1 = arith.constant 0 : i32
    return %c0_i32, %c0_i32_0 : i32, i32
  }
  func.func @transform_6(%arg0: i32, %arg1: i32) -> (i32, i32) {
    %c0_i32 = arith.constant 0 : i32
    %c0_i32_0 = arith.constant 0 : i32
    %c0_i32_1 = arith.constant 0 : i32
    return %c0_i32, %c0_i32_0 : i32, i32
  }
  func.func @transform_7(%arg0: i32, %arg1: i32) -> (i32, i32, i32) {
    %c0_i32 = arith.constant 0 : i32
    %c0_i32_0 = arith.constant 0 : i32
    %c0_i32_1 = arith.constant 0 : i32
    return %arg0, %c0_i32, %c0_i32_0 : i32, i32, i32
  }
}

</mosaic_0001>

<bundles_post_ra>
// kernel: tpu_custom_call.1
= control target key start
LH: loop header
LB: loop body
LE: loop exit
PB: predicated region body
PF: predicated region fallthrough
CT: control target
= control target key end

     0   :  { %s4386_s0 = inlined_call_operand.hbm [shape: f32[16,2,32], index: 0, kind: input, shape index: {}]   ;;  %s4387_s1 = inlined_call_operand.hbm [shape: f32[16,2,32], index: 1, kind: input, shape index: {}]   ;;  %s4388_s2 = inlined_call_operand.hbm [shape: f32[32,32], index: 2, kind: input, shape index: {}]   ;;  %s4389_s3 = inlined_call_operand.hbm [shape: f32[32,64], index: 3, kind: input, shape index: {}]   ;;  %s4390_s4 = inlined_call_operand.hbm [shape: f32[32,32], index: 4, kind: input, shape index: {}]   ;;  %s4391_s5 = inlined_call_operand.vmem [shape: f32[1,32], index: 5, kind: input, shape index: {}]   ;;  %s4392_s6 = inlined_call_operand.vmem [shape: f32[1,32], index: 6, kind: input, shape index: {}]   ;;  %s4393_s7 = inlined_call_operand.hbm [shape: f32[16,2,32], index: 7, kind: output, shape index: {}]  }
   0x1   :  { %4402 = sst [smem:[#allocation26_spill]] %s4386_s0 }
   0x2   :  { %4403 = sst [smem:[#allocation27_spill]] %s4388_s2 }
   0x3   :  { %4404 = sst [smem:[#allocation28_spill]] %s4389_s3 }
   0x4   :  { %4405 = sst [smem:[#allocation29_spill]] %s4390_s4 }
   0x5   :  { %4406 = sst [smem:[#allocation30_spill]] %s4391_s5 }
   0x6   :  { %4407 = sst [smem:[#allocation31_spill]] %s4392_s6 }
   0x7   :  { %4408 = sst [smem:[#allocation32_spill]] %s4393_s7 }
   0x8   :  { %12 = vsyncpa [#allocation7], 0 }
   0x9   :  { %14 = vsyncpa [#allocation7 + $0x1], 0 }
   0xa   :  { %15 = vsyncpa [#allocation10], 0 }
   0xb   :  { %17 = vsyncpa [#allocation10 + $0x1], 0 }
   0xc   :  { %18 = vsyncpa [#allocation13], 0 }
   0xd   :  { %19 = vsyncpa [#allocation8], 0 }
   0xe   :  { %21 = vsyncpa [#allocation8 + $0x1], 0  ;;  %s3438_s24 = smov 0   ;;  %s3440_s25 = smov 0  }
   0xf   :  { %s3442_s26 = smov 0   ;;  %s3444_s27 = smov 0  }
  0x10   :  { %s3446_s28 = smov 0   ;;  %s3448_s29 = smov 0  }
  0x11   :  { %s3450_s30 = smov 0   ;;  %s3452_s8 = smov 0  }
  0x12   :  { %s3454_s9 = smov 0   ;;  %s3456_s10 = smov 0  }
  0x13   :  { %s3458_s11 = smov 0  }
  0x14 LB: > { %4409 = sst [smem:[#allocation21_spill]] %s3336_s27  ;;  %s3492_s12 = sadd.s32 4294967295, %s3364_s11   ;;  %s3364_s11 = sphi %s3458_s11, %s27_s11   ;;  %s3360_s10 = sphi %s3456_s10, %s4447_s10   ;;  %s3356_s9 = sphi %s3454_s9, %s4446_s9   ;;  %s3352_s8 = sphi %s3452_s8, %s4445_s8   ;;  %s3348_s30 = sphi %s3450_s30, %s4444_s30   ;;  %s3344_s29 = sphi %s3448_s29, %s4443_s29   ;;  %s3340_s28 = sphi %s3446_s28, %s4442_s28   ;;  %s3336_s27 = sphi %s3444_s27, %s4441_s27   ;;  %s3332_s26 = sphi %s3442_s26, %s4440_s26   ;;  %s3328_s25 = sphi %s3440_s25, %s4439_s25   ;;  %s3324_s24 = sphi %s3438_s24, %s4438_s24  }
  0x15   : > { %4410 = sst [smem:[#allocation22_spill]] %s3352_s8  ;;  %p85_p0 = scmp.ne.s32.totalorder %s3328_s25, %s3324_s24 }
  0x16   : > { %p60_p1 = scmp.eq.s32.totalorder %s3492_s12, 0  ;;  %p214_p2 = scmp.eq.s32.totalorder %s3492_s12, 3 }
  0x17   : > { %p2765_p3 = scmp.ge.s32.totalorder %s3364_s11, 1  ;;  %p227_p4 = scmp.lt.s32.totalorder %s3364_s11, 5 }
  0x18   : > { %p3501_p5 = por %p85_p0, %p60_p1  ;;  %s4413_s2 = sld [smem:[#allocation27_spill]] }
  0x19   : > { %p3505_p6 = pnand %p2765_p3, %p227_p4  ;;  %s3366_s18 = smov [#allocation11]  }
  0x1a   : > { %s240_s19 = sshll.u32 %s3366_s18, 4  ;;  %s4415_s3 = sld [smem:[#allocation28_spill]]  ;;  %s241_s19 = int_to_ptr.vmem [resolvable:$true] %s240_s19 }
  0x1b   : > { %p2849_p7 = pneg %p3505_p6  ;;  %s3367_s24 = smov 128  }
  0x1c   : > { %s3368_s15 = smov 8   ;;  %s4416_s4 = sld [smem:[#allocation29_spill]] }
  0x1d   : > { %p3516_p8 = pnand %p2849_p7, %p60_p1  ;;  %s3369_s22 = smov [#allocation12]  }
  0x1e   : > { %s238_s17 = sshll.u32 %s4413_s2, 4  ;;  %s254_s2 = sshll.u32 %s3369_s22, 4  ;;  %s239_s17 = int_to_ptr.hbm [resolvable:$true] %s238_s17  ;;  %s255_s2 = int_to_ptr.vmem [resolvable:$true] %s254_s2 }
  0x1f   : > { %2852 = dma.hbm_to_vmem [thread:$0]  (!%p3516_p8), %s239_s17, 512, %s241_s19, [#allocation10], %s3367_s24, %s3367_s24, %s3368_s15  }
  0x20   : > { %s252_s23 = sshll.u32 %s4415_s3, 4  ;;  %s3370_s3 = smov [#allocation14]   ;;  %s253_s23 = int_to_ptr.hbm [resolvable:$true] %s252_s23 }
  0x21   : > { %2855 = dma.hbm_to_vmem [thread:$0]  (!%p3516_p8), %s253_s23, 512, %s255_s2, [#allocation13], %s3367_s24, %s3367_s24, %s3368_s15  }
  0x22   : > { %s266_s21 = sshll.u32 %s4416_s4, 4  ;;  %s268_s7 = sshll.u32 %s3370_s3, 4  ;;  %s267_s21 = int_to_ptr.hbm [resolvable:$true] %s266_s21  ;;  %s269_s7 = int_to_ptr.vmem [resolvable:$true] %s268_s7 }
  0x23   : > { %2858 = dma.hbm_to_vmem [thread:$0]  (!%p3516_p8), %s267_s21, 512, %s269_s7, [#allocation13], %s3367_s24, %s3367_s24, %s3368_s15  }
  0x24   : > { %s2764_s17 = sadd.s32 4294967294, %s3364_s11   ;;  %p53_p9 = scmp.ne.s32.totalorder %s3344_s29, %s3340_s28 }
  0x25   : > { %p54_p10 = scmp.eq.s32.totalorder %s3364_s11, 0  ;;  %p59_p11 = scmp.ne.s32.totalorder %s3340_s28, %s3336_s27 }
  0x26   : > { %p3542_p12 = por %p214_p2, %p53_p9  ;;  %p220_p13 = scmp.eq.s32.totalorder %s2764_s17, 3 }
  0x27   : > { %p3548_p0 = por %p54_p10, %p53_p9  ;;  %p3554_p3 = por %p60_p1, %p59_p11 }
  0x28   : > { %s4417_s18 = scalar_select %p3542_p12, 1, 0 }
  0x29   : > { %p3558_p4 = por %p220_p13, %p59_p11  ;;  %p2873_p2 = scmp.lt.s32.totalorder %s3364_s11, 4 }
  0x2a   : > { %4418 = sst [smem:[#allocation23_spill]] %s4417_s18  ;;  %s288_s20 = sand.u32 1, %s3344_s29  }
  0x2b   : > { %s4421_s7 = scalar_select %p3558_p4, 1, 0 }
  0x2c   : > { %s2820_s23 = sshll.u32 %s3360_s10, 4  ;;  %s2770_s24 = sshll.u32 %s288_s20, 4 }
  0x2d   : > { %4422 = sst [smem:[#allocation24_spill]] %s4421_s7  ;;  %s292_s16 = scalar_lea.vmem [#allocation6], %s2770_s24 }
  0x2e   : > { %s4423_s0 = sld [smem:[#allocation26_spill]]  ;;  %s300_s19 = sshll.u32 %s292_s16, 4  ;;  %s301_s19 = int_to_ptr.vmem [resolvable:$true] %s300_s19 }
  0x2f   : > { %p2860_p7 = pnand %p2873_p2, %p3548_p0  ;;  %s289_s4 = scalar_lea.sflag [#allocation7], %s288_s20 }
  0x30   : > { %s4397_s7 = smov 32   ;;  %s4398_s27 = smov 2  }
  0x31   : > { %s72_s24 = sadd.s32 1, %s3332_s26  ;;  %p79_p9 = scmp.ne.s32.totalorder %s3332_s26, %s3328_s25 }
  0x32   : > { %s310_s16 = sand.u32 1, %s3364_s11   ;;  %s312_s15 = sand.u32 1, %s3332_s26  }
  0x33   : > { %s4425_s2 = sadd.s32 1, %s3360_s10  ;;  %p3590_p11 = por %p79_p9, %p54_p10 }
  0x34   : > { %s297_s22 = scalar_lea.hbm %s4423_s0, %s2820_s23  ;;  %s36_s23 = sadd.s32 1, %s3356_s9 }
  0x35   : > { %s298_s17 = sshll.u32 %s297_s22, 4  ;;  %p37_p8 = scmp.ge.s32.totalorder %s36_s23, 2  ;;  %s299_s17 = int_to_ptr.hbm [resolvable:$true] %s298_s17 }
  0x36   : > { %2862 = dma.hbm_to_vmem [thread:$0]  (!%p2860_p7), %s299_s17, 256, %s301_s19, %s289_s4, %s4397_s7, %s4397_s7, %s4398_s27  }
  0x37   : > { %s4449_s23 = smov (%p37_p8, %s36_s23), 0  ;;  %s4451_s2 = smov (!%p37_p8, %s4425_s2), %s3360_s10 }
  0x38   : > { %4424 = sst [smem:[#allocation25_spill]] %s4449_s23  ;;  %s69_s20 = ssub.s32 %s3356_s9, %s4449_s23 }
  0x39   : > { %p41_p13 = scmp.ge.s32.totalorder %s4451_s2, 2  ;;  %p70_p0 = scmp.eq.s32.totalorder %s69_s20, 0 }
  0x3a   : > { %s2773_s4 = sshll.u32 %s312_s15, 4  ;;  %s2821_s17 = sshll.u32 %s3356_s9, 4 }
  0x3b   : > { %s4453_s2 = smov (%p41_p13, %s4451_s2), 0  ;;  %s319_s0 = scalar_lea.hbm %s4387_s1, %s2821_s17 }
  0x3c   : > { %s3597_s19 = scalar_select %p70_p0, %s3332_s26, %s72_s24  }
  0x3d   : > { %s43_s22 = ssub.s32 %s3360_s10, %s4453_s2  ;;  %s314_s23 = scalar_lea.vmem [#allocation9], %s2773_s4 }
  0x3e   : > { %p44_p7 = scmp.eq.s32.totalorder %s43_s22, 0  ;;  %s322_s18 = sshll.u32 %s314_s23, 4  ;;  %s323_s18 = int_to_ptr.vmem [resolvable:$true] %s322_s18 }
  0x3f   : > { %s4427_s8 = sadd.s32 1, %s3344_s29  ;;  %s320_s5 = sshll.u32 %s319_s0, 4  ;;  %s321_s5 = int_to_ptr.hbm [resolvable:$true] %s320_s5 }
  0x40   : > { %s3608_s6 = scalar_select %p44_p7, %s3344_s29, %s4427_s8  }
  0x41   : > { %p2863_p10 = pnand %p2873_p2, %p3590_p11  ;;  %s311_s24 = scalar_lea.sflag [#allocation10], %s310_s16 }
  0x42   : > { %s4428_s15 = smov 2   ;;  %s4429_s20 = smov 32  }
  0x43   : > { %2865 = dma.hbm_to_vmem [thread:$0]  (!%p2863_p10), %s321_s5, 256, %s323_s18, %s311_s24, %s4429_s20, %s4429_s20, %s4428_s15  }
  0x44   : > { %334 = sbr.rel (%p3505_p6) target bundleno = 1956 (0x7a4), region = 48  ;;  %s3620_s27 = sand.u32 (!%p3505_p6), 1, %s3340_s28  }
  0x45   : > { %s2777_s0 = sshll.u32 (!%p3505_p6), %s3620_s27, 4  ;;  %s337_s8 = scalar_lea.sflag (!%p3505_p6), [#allocation7], %s3620_s27 }
  0x46   : > { %s3624_s7 = scalar_lea.vmem (!%p3505_p6), [#allocation6], %s2777_s0 }
  0x49   : > { %3303 = dma.done.wait (%p3554_p3), %s337_s8, 256  }
  0x4a   : > { %3305 = vsyncadd (%p3554_p3), %s337_s8, 4294967040  ;;  %s346_s5 = sand.u32 1, %s3492_s12   ;;  %s348_s14 = sand.u32 1, %s3328_s25  }
  0x4b   : > { %s2778_s18 = sshll.u32 %s348_s14, 4  ;;  %s347_s23 = scalar_lea.sflag [#allocation10], %s346_s5 }
  0x4c   : > { %s3632_s16 = scalar_lea.vmem [#allocation9], %s2778_s18 }
  0x4d   : > { %3307 = dma.done.wait (%p3501_p5), %s347_s23, 256  }
  0x4e   : > { %3309 = vsyncadd (%p3501_p5), %s347_s23, 4294967040 }
  0x4f   : > { %3311 = dma.done.wait (%p60_p1), [#allocation10], 512  }
  0x50   : > { %3313 = vsyncadd (%p60_p1), [#allocation10], 4294966784 }
  0x51   : > { %3315 = dma.done.wait (%p60_p1), [#allocation13], 1024  }
  0x52   : > { %3317 = vsyncadd (%p60_p1), [#allocation13], 4294966272  ;;  %s3646_s3 = scalar_lea.vmem [#allocation15], %s2777_s0  ;;  %p2783_p6 = scmp.ne.s32.totalorder %s3348_s30, 0 }
  0x53   : > { %s3373_s12 = smov (!%p2783_p6), 104   ;;  %s3374_s13 = smov (!%p2783_p6), 112  }
  0x54   : > { %408 = sbr.rel (%p2783_p6) target bundleno = 383 (0x17f), region = 72  ;;  %s3375_s21 = smov (!%p2783_p6), 120  }
  0x59   : > { %v420_v0 = vld [vmem:[#allocation11 + $0x18] sm:$0xff]  ;;  %v419_v1 = vld [vmem:[#allocation11 + $0x10] sm:$0xff]  ;;  %v418_v2 = vld [vmem:[#allocation11 + $0x8] sm:$0xff]  ;;  %vm446_vm0 = vcmask 261120   ;;  %vm724_vm1 = vcmask 7168   ;;  %v3377_v18 = vmov -inf  }
  0x5a   : > { %463 = vmatpush.msra.mxu0 %v420_v0  ;;  %v409_v3 = vld [vmem:[%s3624_s7] sm:$0x3]  ;;  %v410_v4 = vld [vmem:[%s3624_s7 + $0x2] sm:$0x3]  ;;  %2823 = vmatpush.msra.mxu1 %v420_v0  ;;  %v411_v5 = vld [vmem:[%s3624_s7 + $0x4] sm:$0x3] }
  0x5b   : > { %v412_v6 = vld [vmem:[%s3624_s7 + $0x6] sm:$0x3]  ;;  %429 = vst [vmem:[#allocation1] ss:$4 sm:$0xff] %v409_v3  ;;  %v413_v7 = vld [vmem:[%s3624_s7 + $0x8] sm:$0x3] }
  0x5c   : > { %464 = vmatpush.msra.mxu0 %v419_v1  ;;  %431 = vst [vmem:[#allocation1 + $0x1] ss:$4 sm:$0xff] %v410_v4  ;;  %2824 = vmatpush.msra.mxu1 %v419_v1  ;;  %v417_v8 = vld [vmem:[#allocation11] sm:$0xff]  ;;  %v414_v9 = vld [vmem:[%s3624_s7 + $0xa] sm:$0x3]  ;;  %vm495_vm2 = vcmask 1047556  }
  0x5d   : > { %433 = vst [vmem:[#allocation1 + $0x2] ss:$4 sm:$0xff] %v411_v5  ;;  %v415_v10 = vld [vmem:[%s3624_s7 + $0xc] sm:$0x3]  ;;  %v416_v11 = vld [vmem:[%s3624_s7 + $0xe] sm:$0x3] }
  0x5e   : > { %465 = vmatpush.msra.mxu0 %v418_v2  ;;  %435 = vst [vmem:[#allocation1 + $0x3] ss:$4 sm:$0xff] %v412_v6  ;;  %2825 = vmatpush.msra.mxu1 %v418_v2  ;;  %v3376_v16 = vmov 1983009808   ;;  %v3378_v24 = vmov 1934713408  }
  0x5f   : > { %437 = vst [vmem:[#allocation1 + $0x20] ss:$4 sm:$0xff] %v413_v7  ;;  %v500_v17 = vunpack.c.l.s4 %v3376_v16  ;;  %v524_v25 = vunpack.c.l.s4 %v3378_v24  ;;  %v3379_v32 = vmov 0.0   ;;  %vm715_vm3 = vcmask 64512  }
  0x60   : > { %466 = vmatpush.msra.mxu0 %v417_v8  ;;  %2826 = vmatpush.msra.mxu1 %v417_v8  ;;  %439 = vst [vmem:[#allocation1 + $0x21] ss:$4 sm:$0xff] %v414_v9 }
  0x61   : > { %441 = vst [vmem:[#allocation1 + $0x22] ss:$4 sm:$0xff] %v415_v10  ;;  %v3666_v20 = vunpack.c.0.s8 %v500_v17  ;;  %v3682_v37 = vunpack.c.0.s8 %v524_v25 }
  0x62   : > { %443 = vst [vmem:[#allocation1 + $0x23] ss:$4 sm:$0xff] %v416_v11 }
  0x63   : > { %725 = vst.msk [vmem:[#allocation3] sm:$0xff] %vm724_vm1, %v3377_v18 }
  0x64   : > { %726 = vst.msk [vmem:[#allocation3 + $0x8] sm:$0xff] %vm724_vm1, %v3377_v18 }
  0x65   : > { %v444_v12 = vld.sshfl [vmem:[#allocation1] sm:$0xff pattern:$0x73625140]  ;;  %727 = vst.msk [vmem:[#allocation3 + $0x10] sm:$0xff] %vm724_vm1, %v3377_v18 }
  0x66   : > { %2784 = vmatmul.msk.f32.vlgmr.msra.gmra.mxu0 %vm446_vm0, %v444_v12  ;;  %728 = vst.msk [vmem:[#allocation3 + $0x18] sm:$0xff] %vm724_vm1, %v3377_v18 }
  0x67   : > { %729 = vst.msk [vmem:[#allocation3 + $0x20] sm:$0xff] %vm724_vm1, %v3377_v18 }
  0x68   : > { %730 = vst.msk [vmem:[#allocation3 + $0x28] sm:$0xff] %vm724_vm1, %v3377_v18 }
  0x69   : > { %v445_v13 = vld.sshfl [vmem:[#allocation1 + $0x20] sm:$0xff pattern:$0x73625140]  ;;  %731 = vst.msk [vmem:[#allocation3 + $0x30] sm:$0xff] %vm724_vm1, %v3377_v18 }
  0x6a   : > { %2785 = vmatmul.msk.f32.vlgmr.msra.gmra.mxu1 %vm446_vm0, %v445_v13  ;;  %732 = vst.msk [vmem:[#allocation3 + $0x38] sm:$0xff] %vm724_vm1, %v3377_v18 }
  0x6b   : > { %733 = vst.msk [vmem:[#allocation4] sm:$0xff] %vm724_vm1, %v3379_v32 }
  0x6c   : > { %734 = vst.msk [vmem:[#allocation4 + $0x8] sm:$0xff] %vm724_vm1, %v3379_v32 }
  0x6d   : > { %735 = vst.msk [vmem:[#allocation4 + $0x10] sm:$0xff] %vm724_vm1, %v3379_v32 }
  0x6e   : > { %736 = vst.msk [vmem:[#allocation4 + $0x18] sm:$0xff] %vm724_vm1, %v3379_v32 }
  0x6f   : > { %737 = vst.msk [vmem:[#allocation4 + $0x20] sm:$0xff] %vm724_vm1, %v3379_v32 }
  0x70   : > { %738 = vst.msk [vmem:[#allocation4 + $0x28] sm:$0xff] %vm724_vm1, %v3379_v32 }
  0x71   : > { %739 = vst.msk [vmem:[#allocation4 + $0x30] sm:$0xff] %vm724_vm1, %v3379_v32 }
  0x72   : > { %740 = vst.msk [vmem:[#allocation4 + $0x38] sm:$0xff] %vm724_vm1, %v3379_v32 }
  0x73   : > { %741 = vst.msk [vmem:[#allocation5] sm:$0xff] %vm715_vm3, %v3379_v32 }
  0x74   : > { %742 = vst.msk [vmem:[#allocation5 + $0x8] sm:$0xff] %vm715_vm3, %v3379_v32 }
  0x75   : > { %743 = vst.msk [vmem:[#allocation5 + $0x10] sm:$0xff] %vm715_vm3, %v3379_v32 }
  0x76   : > { %744 = vst.msk [vmem:[#allocation5 + $0x18] sm:$0xff] %vm715_vm3, %v3379_v32 }
  0x77   : > { %745 = vst.msk [vmem:[#allocation5 + $0x20] sm:$0xff] %vm715_vm3, %v3379_v32 }
  0x78   : > { %746 = vst.msk [vmem:[#allocation5 + $0x28] sm:$0xff] %vm715_vm3, %v3379_v32 }
  0x79   : > { %747 = vst.msk [vmem:[#allocation5 + $0x30] sm:$0xff] %vm715_vm3, %v3379_v32 }
  0x7a   : > { %748 = vst.msk [vmem:[#allocation5 + $0x38] sm:$0xff] %vm715_vm3, %v3379_v32 }
  0xe3   : > { %v468_v14 = vpop.f32.mrf.mxu0 }
  0xe4   : > { %488 = vrot.lane.b32.xlu2 %v468_v14, %s3373_s12  ;;  %482 = vrot.lane.b32.xlu1 %v468_v14, %s3374_s13  ;;  %v497_v21 = vrot.slane %v468_v14, 4 }
  0xe5   : > { %476 = vrot.lane.b32.xlu0 %v468_v14, %s3375_s21 }
  0xe7   : > { %v3657_v15 = vpop.f32.mrf.mxu1 }
  0xe8   : > { %v553_v42 = vrot.slane %v3657_v15, 4 }
  0xec   : > { %490 = vrot.lane.b32.xlu2 %v3657_v15, %s3373_s12  ;;  %484 = vrot.lane.b32.xlu1 %v3657_v15, %s3374_s13 }
  0xed   : > { %478 = vrot.lane.b32.xlu0 %v3657_v15, %s3375_s21 }
 0x13e   : > { %v489_v19 = vpop.permute.xlu2 %488 }
 0x13f   : > { %v507_v22 = vrot.slane %v489_v19, 4 }
 0x146   : > { %v491_v46 = vpop.permute.xlu2 %490 }
 0x147   : > { %v563_v58 = vrot.slane %v491_v46, 4 }
 0x156   : > { %v483_v23 = vpop.permute.xlu1 %482 }
 0x157   : > { %v494_v26 = vrot.slane %v483_v23, 4  ;;  %v498_v27 = vsel %vm495_vm2, %v483_v23, %v497_v21  ;;  %v477_v28 = vpop.permute.xlu0 %476 }
 0x158   : > { %v506_v29 = vperm.slane %v498_v27, %v3666_v20  ;;  %v508_v30 = vsel %vm495_vm2, %v507_v22, %v477_v28  ;;  %v509_v31 = vrot.slane %v477_v28, 4 }
 0x159   : > { %v496_v33 = vsel %vm495_vm2, %v494_v26, %v468_v14  ;;  %v514_v34 = vperm.slane %v508_v30, %v3666_v20 }
 0x15a   : > { %v502_v35 = vperm.slane %v496_v33, %v3666_v20  ;;  %v533_v36 = vrot.slane %v506_v29, 4  ;;  %v510_v38 = vsel %vm495_vm2, %v489_v19, %v509_v31 }
 0x15b   : > { %v518_v39 = vperm.slane %v510_v38, %v3666_v20  ;;  %v519_v40 = vrot.slane %v514_v34, 4 }
 0x15c   : > { %v521_v41 = vrot.slane %v502_v35, 4 }
 0x15d   : > { %v520_v43 = vsel %vm495_vm2, %v519_v40, %v502_v35  ;;  %v531_v44 = vrot.slane %v518_v39, 4  ;;  %v534_v45 = vsel %vm495_vm2, %v518_v39, %v533_v36 }
 0x15e   : > { %v522_v47 = vsel %vm495_vm2, %v514_v34, %v521_v41  ;;  %v526_v48 = vperm.slane %v520_v43, %v3682_v37  ;;  %v542_v49 = vperm.slane %v534_v45, %v3682_v37  ;;  %v485_v50 = vpop.permute.xlu1 %484 }
 0x15f   : > { %v530_v51 = vperm.slane %v522_v47, %v3682_v37  ;;  %v532_v52 = vsel %vm495_vm2, %v531_v44, %v506_v29  ;;  %v551_v53 = vrot.slane %v485_v50, 4  ;;  %v554_v54 = vsel %vm495_vm2, %v485_v50, %v553_v42  ;;  %v479_v55 = vpop.permute.xlu0 %478 }
 0x160   : > { %v538_v56 = vperm.slane %v532_v52, %v3682_v37  ;;  %v549_v57 = vrot.slane %v542_v49, 4  ;;  %v565_v61 = vrot.slane %v479_v55, 4  ;;  %v543_v62 = vrot.slane %v526_v48, 4 }
 0x161   : > { %v545_v59 = vrot.slane %v530_v51, 4  ;;  %v552_v60 = vsel %vm495_vm2, %v551_v53, %v3657_v15  ;;  %v562_v1 = vperm.slane %v554_v54, %v3666_v20  ;;  %v564_v5 = vsel %vm495_vm2, %v563_v58, %v479_v55 }
 0x162   : > { %v547_v63 = vrot.slane %v538_v56, 4  ;;  %v550_v0 = vsel %vm495_vm2, 0.0, %v549_v57  ;;  %v612_v2 = vsel %vm495_vm2, %v549_v57, %v530_v51  ;;  %v558_v4 = vperm.slane %v552_v60, %v3666_v20 }
 0x163   : > { %v665_v3 = vrot.slane %v550_v0, 4  ;;  %v546_v6 = vsel %vm495_vm2, 0.0, %v545_v59  ;;  %v566_v9 = vsel %vm495_vm2, %v491_v46, %v565_v61  ;;  %v589_v13 = vrot.slane %v562_v1, 4 }
 0x164   : > { %v548_v7 = vsel %vm495_vm2, 0.0, %v547_v63  ;;  %v607_v8 = vsel %vm495_vm2, %v547_v63, %v526_v48  ;;  %v577_v12 = vrot.slane %v558_v4, 4  ;;  %v570_v14 = vperm.slane %v564_v5, %v3666_v20 }
 0x165   : > { %v611_v10 = vperm.slane %v607_v8, %v3666_v20  ;;  %v659_v11 = vrot.slane %v548_v7, 4  ;;  %v574_v15 = vperm.slane %v566_v9, %v3666_v20  ;;  %v616_v16 = vperm.slane %v612_v2, %v3666_v20 }
 0x166   : > { %v666_v17 = vsel %vm495_vm2, %v665_v3, %v546_v6  ;;  %v544_v18 = vsel %vm495_vm2, 0.0, %v543_v62  ;;  %v575_v21 = vrot.slane %v570_v14, 4  ;;  %v578_v23 = vsel %vm495_vm2, %v570_v14, %v577_v12 }
 0x167   : > { %v629_v19 = vrot.slane %v611_v10, 4  ;;  %v660_v22 = vsel %vm495_vm2, %v659_v11, %v544_v18  ;;  %v587_v24 = vrot.slane %v574_v15, 4  ;;  %v670_v25 = vperm.slane %v666_v17, %v3666_v20 }
 0x168   : > { %v590_v26 = vsel %vm495_vm2, %v574_v15, %v589_v13  ;;  %v627_v27 = vrot.slane %v616_v16, 4  ;;  %v576_v28 = vsel %vm495_vm2, %v575_v21, %v558_v4  ;;  %v586_v29 = vperm.slane %v578_v23, %v3682_v37 }
 0x169   : > { %v588_v30 = vsel %vm495_vm2, %v587_v24, %v562_v1  ;;  %v630_v31 = vsel %vm495_vm2, %v616_v16, %v629_v19  ;;  %v664_v32 = vperm.slane %v660_v22, %v3666_v20  ;;  %v582_v33 = vperm.slane %v576_v28, %v3682_v37 }
 0x16a   : > { %v594_v34 = vperm.slane %v588_v30, %v3682_v37  ;;  %v598_v35 = vperm.slane %v590_v26, %v3682_v37  ;;  %v601_v36 = vrot.slane %v586_v29, 4  ;;  %v683_v38 = vrot.slane %v670_v25, 4 }
 0x16b   : > { %v599_v39 = vrot.slane %v582_v33, 4  ;;  %v628_v41 = vsel %vm495_vm2, %v627_v27, %v611_v10  ;;  %v638_v42 = vperm.slane %v630_v31, %v3682_v37  ;;  %v685_v44 = vrot.slane %v664_v32, 4 }
 0x16c   : > { %v603_v40 = vrot.slane %v594_v34, 4  ;;  %v605_v43 = vrot.slane %v598_v35, 4  ;;  %v602_v45 = vsel %vm495_vm2, 0.0, %v601_v36  ;;  %v684_v52 = vsel %vm495_vm2, %v683_v38, %v664_v32 }
 0x16d   : > { %v600_v53 = vsel %vm495_vm2, 0.0, %v599_v39  ;;  %v634_v56 = vperm.slane %v628_v41, %v3682_v37  ;;  %v686_v59 = vsel %vm495_vm2, %v670_v25, %v685_v44  ;;  %v690_v63 = vperm.slane %v684_v52, %v3682_v37 }
 0x16e   : > { %v604_v46 = vsel %vm495_vm2, 0.0, %v603_v40  ;;  %v617_v47 = vsel %vm495_vm2, %v603_v40, %v582_v33  ;;  %v606_v48 = vsel %vm495_vm2, 0.0, %v605_v43  ;;  %v622_v50 = vsel %vm495_vm2, %v605_v43, %v586_v29 }
 0x16f   : > { %v621_v49 = vperm.slane %v617_v47, %v3666_v20  ;;  %v671_v51 = vrot.slane %v604_v46, 4  ;;  %v626_v54 = vperm.slane %v622_v50, %v3666_v20  ;;  %v677_v55 = vrot.slane %v606_v48, 4 }
 0x170   : > { %v657_v2 = vrot.slane %v638_v42, 4  ;;  %v653_v6 = vrot.slane %v634_v56, 4  ;;  %v694_v7 = vperm.slane %v686_v59, %v3682_v37  ;;  %v709_v16 = vrot.slane %v690_v63, 4 }
 0x171   : > { %v641_v57 = vrot.slane %v621_v49, 4  ;;  %v672_v58 = vsel %vm495_vm2, %v671_v51, %v600_v53  ;;  %v639_v60 = vrot.slane %v626_v54, 4  ;;  %v678_v62 = vsel %vm495_vm2, %v677_v55, %v602_v45 }
 0x172   : > { %v676_v61 = vperm.slane %v672_v58, %v3666_v20  ;;  %v682_v1 = vperm.slane %v678_v62, %v3666_v20  ;;  %v713_v19 = vrot.slane %v694_v7, 4 }
 0x173   : > { %v642_v0 = vsel %vm495_vm2, %v626_v54, %v641_v57  ;;  %v640_v3 = vsel %vm495_vm2, %v639_v60, %v621_v49 }
 0x174   : > { %v650_v4 = vperm.slane %v642_v0, %v3682_v37  ;;  %v697_v5 = vrot.slane %v676_v61, 4  ;;  %v646_v8 = vperm.slane %v640_v3, %v3682_v37  ;;  %v695_v9 = vrot.slane %v682_v1, 4 }
 0x176   : > { %v655_v10 = vrot.slane %v650_v4, 4  ;;  %v658_v11 = vsel %vm495_vm2, %v650_v4, %v657_v2  ;;  %v698_v12 = vsel %vm495_vm2, %v682_v1, %v697_v5  ;;  %v651_v13 = vrot.slane %v646_v8, 4 }
 0x177   : > { %v654_v20 = vsel %vm495_vm2, %v646_v8, %v653_v6  ;;  %v696_v14 = vsel %vm495_vm2, %v695_v9, %v676_v61  ;;  %v706_v15 = vperm.slane %v698_v12, %v3682_v37  ;;  %719 = vst.msk [vmem:[#allocation2 + $0x18] sm:$0xff] %vm715_vm3, %v658_v11 }
 0x178   : > { %v656_v17 = vsel %vm495_vm2, %v655_v10, %v638_v42  ;;  %v702_v18 = vperm.slane %v696_v14, %v3682_v37  ;;  %717 = vst.msk [vmem:[#allocation2 + $0x8] sm:$0xff] %vm715_vm3, %v654_v20  ;;  %v652_v21 = vsel %vm495_vm2, %v651_v13, %v634_v56 }
 0x179   : > { %v711_v22 = vrot.slane %v706_v15, 4  ;;  %718 = vst.msk [vmem:[#allocation2 + $0x10] sm:$0xff] %vm715_vm3, %v656_v17  ;;  %v714_v26 = vsel %vm495_vm2, %v706_v15, %v713_v19 }
 0x17a   : > { %v707_v23 = vrot.slane %v702_v18, 4  ;;  %v710_v24 = vsel %vm495_vm2, %v702_v18, %v709_v16  ;;  %716 = vst.msk [vmem:[#allocation2] sm:$0xff] %vm715_vm3, %v652_v21 }
 0x17b   : > { %v712_v25 = vsel %vm495_vm2, %v711_v22, %v694_v7  ;;  %721 = vst.msk [vmem:[#allocation2 + $0x28] sm:$0xff] %vm715_vm3, %v710_v24 }
 0x17c   : > { %v708_v37 = vsel %vm495_vm2, %v707_v23, %v690_v63  ;;  %722 = vst.msk [vmem:[#allocation2 + $0x30] sm:$0xff] %vm715_vm3, %v712_v25 }
 0x17d   : > { %720 = vst.msk [vmem:[#allocation2 + $0x20] sm:$0xff] %vm715_vm3, %v708_v37 }
 0x17e   : > { %723 = vst.msk [vmem:[#allocation2 + $0x38] sm:$0xff] %vm715_vm3, %v714_v26 }
 0x17f PF: > { %v760_v27 = vld [vmem:[#allocation12 + $0x18] sm:$0xff]  ;;  %v759_v28 = vld [vmem:[#allocation12 + $0x10] sm:$0xff]  ;;  %v758_v29 = vld [vmem:[#allocation12 + $0x8] sm:$0xff]  ;;  %vm786_vm4 = vcmask 261120   ;;  %s3380_s4 = smov 104   ;;  %s3381_s22 = smov 120  }
 0x180   : > { %803 = vmatpush.msra.mxu0 %v760_v27  ;;  %v749_v30 = vld [vmem:[%s3632_s16] sm:$0x3]  ;;  %v750_v31 = vld [vmem:[%s3632_s16 + $0x2] sm:$0x3]  ;;  %v751_v32 = vld [vmem:[%s3632_s16 + $0x4] sm:$0x3] }
 0x181   : > { %v752_v33 = vld [vmem:[%s3632_s16 + $0x6] sm:$0x3]  ;;  %769 = vst [vmem:[#allocation1] ss:$4 sm:$0xff] %v749_v30  ;;  %v753_v34 = vld [vmem:[%s3632_s16 + $0x8] sm:$0x3] }
 0x182   : > { %804 = vmatpush.msra.mxu0 %v759_v28  ;;  %771 = vst [vmem:[#allocation1 + $0x1] ss:$4 sm:$0xff] %v750_v31  ;;  %v757_v35 = vld [vmem:[#allocation12] sm:$0xff]  ;;  %v754_v36 = vld [vmem:[%s3632_s16 + $0xa] sm:$0x3]  ;;  %s3382_s17 = smov 112  }
 0x183   : > { %773 = vst [vmem:[#allocation1 + $0x2] ss:$4 sm:$0xff] %v751_v32  ;;  %v755_v38 = vld [vmem:[%s3632_s16 + $0xc] sm:$0x3]  ;;  %v756_v39 = vld [vmem:[%s3632_s16 + $0xe] sm:$0x3] }
 0x184   : > { %805 = vmatpush.msra.mxu0 %v758_v29  ;;  %775 = vst [vmem:[#allocation1 + $0x3] ss:$4 sm:$0xff] %v752_v33  ;;  %v3383_v45 = vmov 1983009808   ;;  %vm835_vm5 = vcmask 1047556   ;;  %s3384_s24 = smov 96  }
 0x185   : > { %777 = vst [vmem:[#allocation1 + $0x20] ss:$4 sm:$0xff] %v753_v34  ;;  %v840_v46 = vunpack.c.l.s4 %v3383_v45  ;;  %v3385_v54 = vmov 1934713408   ;;  %vm1307_vm6 = vcmask 64512   ;;  %vm1692_vm7 = vcmask 7168  }
 0x186   : > { %806 = vmatpush.msra.mxu0 %v757_v35  ;;  %779 = vst [vmem:[#allocation1 + $0x21] ss:$4 sm:$0xff] %v754_v36  ;;  %v864_v55 = vunpack.c.l.s4 %v3385_v54  ;;  %p2812_p1 = scmp.ne.s32.totalorder %s3348_s30, 1 }
 0x187   : > { %781 = vst [vmem:[#allocation1 + $0x22] ss:$4 sm:$0xff] %v755_v38  ;;  %v3815_v51 = vunpack.c.0.s8 %v840_v46  ;;  %s3388_s30 = smov (!%p2812_p1), 8   ;;  %s3389_s15 = smov (!%p2812_p1), 16  }
 0x188   : > { %783 = vst [vmem:[#allocation1 + $0x23] ss:$4 sm:$0xff] %v756_v39  ;;  %v3823_v61 = vunpack.c.0.s8 %v864_v55  ;;  %s3390_s20 = smov (!%p2812_p1), 24   ;;  %s4431_s18 = sld [smem:[#allocation31_spill]] (!%p2812_p1) }
 0x18b   : > { %v784_v40 = vld.sshfl [vmem:[#allocation1] sm:$0xff pattern:$0x73625140] }
 0x18c   : > { %2786 = vmatmul.msk.f32.vlgmr.msra.gmra.mxu0 %vm786_vm4, %v784_v40 }
 0x18f   : > { %v785_v41 = vld.sshfl [vmem:[#allocation1 + $0x20] sm:$0xff pattern:$0x73625140] }
 0x194   : > { %2787 = vmatmul.msk.f32.gmra.mxu0 %vm786_vm4, %v785_v41 }
 0x209   : > { %v808_v42 = vpop.f32.mrf.mxu0 }
 0x20a   : > { %828 = vrot.lane.b32.xlu2 %v808_v42, %s3380_s4  ;;  %816 = vrot.lane.b32.xlu0 %v808_v42, %s3381_s22  ;;  %v837_v59 = vrot.slane %v808_v42, 4 }
 0x211   : > { %v3806_v43 = vpop.f32.mrf.mxu0 }
 0x212   : > { %822 = vrot.lane.b32.xlu0 %v808_v42, %s3382_s17  ;;  %830 = vrot.lane.b32.xlu2 %v3806_v43, %s3380_s4  ;;  %v893_v24 = vrot.slane %v3806_v43, 4 }
 0x213   : > { %818 = vrot.lane.b32.xlu1 %v3806_v43, %s3381_s22 }
 0x21b   : > { %824 = vrot.lane.b32.xlu1 %v3806_v43, %s3382_s17 }
 0x264   : > { %v3811_v44 = vpop.permute.xlu2 %828 }
 0x265   : > { %v847_v50 = vrot.slane %v3811_v44, 4 }
 0x26c   : > { %v831_v56 = vpop.permute.xlu2 %830 }
 0x26d   : > { %v903_v60 = vrot.slane %v831_v56, 4 }
 0x27c   : > { %v817_v47 = vpop.permute.xlu0 %816 }
 0x27d   : > { %v849_v48 = vrot.slane %v817_v47, 4  ;;  %v2998_v49 = vpack.i.bf16 %v817_v47, %v3806_v43  ;;  %v848_v53 = vsel %vm835_vm5, %v847_v50, %v817_v47 }
 0x27e   : > { %v854_v58 = vperm.slane %v848_v53, %v3815_v51 }
 0x27f   : > { %v850_v52 = vsel %vm835_vm5, %v3811_v44, %v849_v48  ;;  %2999 = vrot.lane.b32.xlu1 %v2998_v49, %s3384_s24 }
 0x280   : > { %v858_v57 = vperm.slane %v850_v52, %v3815_v51  ;;  %v859_v8 = vrot.slane %v854_v58, 4 }
 0x282   : > { %v871_v63 = vrot.slane %v858_v57, 4 }
 0x284   : > { %v823_v62 = vpop.permute.xlu0 %822 }
 0x285   : > { %v834_v0 = vrot.slane %v823_v62, 4  ;;  %v838_v1 = vsel %vm835_vm5, %v823_v62, %v837_v59  ;;  %v3013_v2 = vpack.i.bf16 %v831_v56, %v823_v62  ;;  %v819_v3 = vpop.permute.xlu1 %818 }
 0x286   : > { %v846_v4 = vperm.slane %v838_v1, %v3815_v51  ;;  %v904_v5 = vsel %vm835_vm5, %v903_v60, %v819_v3  ;;  %v905_v6 = vrot.slane %v819_v3, 4  ;;  %v3003_v7 = vpack.i.bf16 %v819_v3, %v808_v42 }
 0x287   : > { %v836_v9 = vsel %vm835_vm5, %v834_v0, %v808_v42  ;;  %3014 = vrot.lane.b32.xlu1 %v3013_v2, %s3384_s24  ;;  %v910_v14 = vperm.slane %v904_v5, %v3815_v51 }
 0x288   : > { %v842_v10 = vperm.slane %v836_v9, %v3815_v51  ;;  %v872_v11 = vsel %vm835_vm5, %v871_v63, %v846_v4  ;;  %v873_v12 = vrot.slane %v846_v4, 4  ;;  %v906_v13 = vsel %vm835_vm5, %v831_v56, %v905_v6  ;;  %3004 = vrot.lane.b32.xlu2 %v3003_v7, %s3384_s24 }
 0x289   : > { %v878_v20 = vperm.slane %v872_v11, %v3823_v61  ;;  %v914_v22 = vperm.slane %v906_v13, %v3815_v51  ;;  %v915_v27 = vrot.slane %v910_v14, 4 }
 0x28a   : > { %v860_v15 = vsel %vm835_vm5, %v859_v8, %v842_v10  ;;  %v861_v16 = vrot.slane %v842_v10, 4  ;;  %v874_v17 = vsel %vm835_vm5, %v858_v57, %v873_v12 }
 0x28b   : > { %v866_v18 = vperm.slane %v860_v15, %v3823_v61  ;;  %v882_v19 = vperm.slane %v874_v17, %v3823_v61  ;;  %v887_v21 = vrot.slane %v878_v20, 4  ;;  %v927_v34 = vrot.slane %v914_v22, 4 }
 0x28c   : > { %v862_v23 = vsel %vm835_vm5, %v854_v58, %v861_v16 }
 0x28d   : > { %v870_v25 = vperm.slane %v862_v23, %v3823_v61  ;;  %v888_v26 = vsel %vm835_vm5, 0.0, %v887_v21  ;;  %v889_v37 = vrot.slane %v882_v19, 4  ;;  %v825_v28 = vpop.permute.xlu1 %824  ;;  %v883_v29 = vrot.slane %v866_v18, 4 }
 0x28e   : > { %v891_v30 = vrot.slane %v825_v28, 4  ;;  %v3008_v31 = vpack.i.bf16 %v3811_v44, %v825_v28  ;;  %v894_v32 = vsel %vm835_vm5, %v825_v28, %v893_v24  ;;  %v999_v33 = vrot.slane %v888_v26, 4 }
 0x28f   : > { %v902_v35 = vperm.slane %v894_v32, %v3815_v51  ;;  %v947_v36 = vsel %vm835_vm5, %v887_v21, %v866_v18  ;;  %v885_v38 = vrot.slane %v870_v25, 4  ;;  %v952_v41 = vsel %vm835_vm5, %v889_v37, %v870_v25 }
 0x290   : > { %v892_v39 = vsel %vm835_vm5, %v891_v30, %v3806_v43  ;;  %3009 = vrot.lane.b32.xlu0 %v3008_v31, %s3384_s24  ;;  %v951_v40 = vperm.slane %v947_v36, %v3815_v51  ;;  %v956_v46 = vperm.slane %v952_v41, %v3815_v51  ;;  %v890_v47 = vsel %vm835_vm5, 0.0, %v889_v37 }
 0x291   : > { %v898_v42 = vperm.slane %v892_v39, %v3815_v51  ;;  %v928_v44 = vsel %vm835_vm5, %v927_v34, %v902_v35  ;;  %v929_v45 = vrot.slane %v902_v35, 4  ;;  %v884_v43 = vsel %vm835_vm5, 0.0, %v883_v29 }
 0x292   : > { %v934_v48 = vperm.slane %v928_v44, %v3823_v61  ;;  %v969_v49 = vrot.slane %v951_v40, 4  ;;  %v967_v54 = vrot.slane %v956_v46, 4  ;;  %v1005_v59 = vrot.slane %v890_v47, 4 }
 0x293   : > { %v916_v50 = vsel %vm835_vm5, %v915_v27, %v898_v42  ;;  %v917_v52 = vrot.slane %v898_v42, 4  ;;  %v930_v53 = vsel %vm835_vm5, %v914_v22, %v929_v45  ;;  %v886_v63 = vsel %vm835_vm5, 0.0, %v885_v38  ;;  %v1300_v45 = vld [vmem:[#allocation2 + $0x8] sm:$0xff] }
 0x294   : > { %v922_v55 = vperm.slane %v916_v50, %v3823_v61  ;;  %v938_v56 = vperm.slane %v930_v53, %v3823_v61  ;;  %v943_v57 = vrot.slane %v934_v48, 4  ;;  %v970_v58 = vsel %vm835_vm5, %v956_v46, %v969_v49  ;;  %v1299_v53 = vld [vmem:[#allocation2] sm:$0xff] }
 0x295   : > { %v918_v60 = vsel %vm835_vm5, %v910_v14, %v917_v52  ;;  %v968_v62 = vsel %vm835_vm5, %v967_v54, %v951_v40  ;;  %v978_v6 = vperm.slane %v970_v58, %v3823_v61  ;;  %v1000_v7 = vsel %vm835_vm5, %v999_v33, %v884_v43 }
 0x296   : > { %v926_v0 = vperm.slane %v918_v60, %v3823_v61  ;;  %v939_v1 = vrot.slane %v922_v55, 4  ;;  %v944_v2 = vsel %vm835_vm5, 0.0, %v943_v57  ;;  %v945_v3 = vrot.slane %v938_v56, 4 }
 0x297   : > { %v1011_v4 = vrot.slane %v944_v2, 4  ;;  %v957_v5 = vsel %vm835_vm5, %v943_v57, %v922_v55  ;;  %v974_v20 = vperm.slane %v968_v62, %v3823_v61  ;;  %v1004_v17 = vperm.slane %v1000_v7, %v3815_v51  ;;  %v1306_v2 = vld [vmem:[#allocation2 + $0x38] sm:$0xff] }
 0x298   : > { %v941_v8 = vrot.slane %v926_v0, 4  ;;  %v946_v9 = vsel %vm835_vm5, 0.0, %v945_v3  ;;  %v961_v10 = vperm.slane %v957_v5, %v3815_v51  ;;  %v962_v11 = vsel %vm835_vm5, %v945_v3, %v926_v0  ;;  %v1302_v0 = vld [vmem:[#allocation2 + $0x18] sm:$0xff]  ;;  %v1305_v3 = vld [vmem:[#allocation2 + $0x30] sm:$0xff] }
 0x299   : > { %v1017_v12 = vrot.slane %v946_v9, 4  ;;  %v966_v13 = vperm.slane %v962_v11, %v3815_v51  ;;  %v940_v14 = vsel %vm835_vm5, 0.0, %v939_v1  ;;  %v1006_v18 = vsel %vm835_vm5, %v1005_v59, %v886_v63  ;;  %v1301_v59 = vld [vmem:[#allocation2 + $0x10] sm:$0xff]  ;;  %v1303_v63 = vld [vmem:[#allocation2 + $0x20] sm:$0xff]  ;;  %v1304_v1 = vld [vmem:[#allocation2 + $0x28] sm:$0xff] }
 0x29a   : > { %v981_v15 = vrot.slane %v961_v10, 4  ;;  %v942_v16 = vsel %vm835_vm5, 0.0, %v941_v8  ;;  %v1010_v21 = vperm.slane %v1006_v18, %v3815_v51  ;;  %v1012_v22 = vsel %vm835_vm5, %v1011_v4, %v940_v14 }
 0x29b   : > { %v979_v19 = vrot.slane %v966_v13, 4  ;;  %v1018_v23 = vsel %vm835_vm5, %v1017_v12, %v942_v16  ;;  %v1016_v25 = vperm.slane %v1012_v22, %v3815_v51  ;;  %v1025_v37 = vrot.slane %v1004_v17, 4 }
 0x29c   : > { %v982_v24 = vsel %vm835_vm5, %v966_v13, %v981_v15  ;;  %v1022_v26 = vperm.slane %v1018_v23, %v3815_v51  ;;  %v993_v28 = vrot.slane %v974_v20, 4  ;;  %v1023_v30 = vrot.slane %v1010_v21, 4 }
 0x29d   : > { %v980_v27 = vsel %vm835_vm5, %v979_v19, %v961_v10  ;;  %v990_v29 = vperm.slane %v982_v24, %v3823_v61  ;;  %v1037_v33 = vrot.slane %v1016_v25, 4  ;;  %v1026_v34 = vsel %vm835_vm5, %v1010_v21, %v1025_v37 }
 0x29e   : > { %v986_v31 = vperm.slane %v980_v27, %v3823_v61  ;;  %v1035_v32 = vrot.slane %v1022_v26, 4  ;;  %v1024_v36 = vsel %vm835_vm5, %v1023_v30, %v1004_v17  ;;  %v1034_v38 = vperm.slane %v1026_v34, %v3823_v61 }
 0x29f   : > { %v995_v35 = vrot.slane %v990_v29, 4  ;;  %v1030_v41 = vperm.slane %v1024_v36, %v3823_v61  ;;  %v997_v46 = vrot.slane %v978_v6, 4  ;;  %v1038_v48 = vsel %vm835_vm5, %v1022_v26, %v1037_v33 }
 0x2a0   : > { %v994_v39 = vsel %vm835_vm5, %v986_v31, %v993_v28  ;;  %v991_v40 = vrot.slane %v986_v31, 4  ;;  %v1036_v42 = vsel %vm835_vm5, %v1035_v32, %v1016_v25  ;;  %v1046_v50 = vperm.slane %v1038_v48, %v3823_v61 }
 0x2a1   : > { %2790 = vmatpush.xpose.msk.msra.mxu2 %vm1307_vm6, %v994_v39  ;;  %v996_v44 = vsel %vm835_vm5, %v995_v35, %v978_v6  ;;  %v1042_v47 = vperm.slane %v1036_v42, %v3823_v61  ;;  %v1049_v43 = vrot.slane %v1030_v41, 4  ;;  %v998_v52 = vsel %vm835_vm5, %v990_v29, %v997_v46 }
 0x2a2   : > { %2792 = vmatpush.xpose.msk.msra.mxu3 %vm1307_vm6, %v996_v44  ;;  %v992_v49 = vsel %vm835_vm5, %v991_v40, %v974_v20  ;;  %v1051_v56 = vrot.slane %v1046_v50, 4  ;;  %v1053_v57 = vrot.slane %v1034_v38, 4 }
 0x2a3   : > { %2788 = vmatpush.xpose.msk.msra.mxu1 %vm1307_vm6, %v992_v49  ;;  %v1047_v54 = vrot.slane %v1042_v47, 4  ;;  %v1050_v55 = vsel %vm835_vm5, %v1042_v47, %v1049_v43 }
 0x2a4   : > { %2791 = vmatmul.msk.f32.vlgmr.msra.gmra.mxu2 %vm1307_vm6, %v1300_v45  ;;  %v1052_v60 = vsel %vm835_vm5, %v1051_v56, %v1034_v38  ;;  %v1054_v62 = vsel %vm835_vm5, %v1046_v50, %v1053_v57 }
 0x2a5   : > { %v1048_v58 = vsel %vm835_vm5, %v1047_v54, %v1030_v41  ;;  %2793 = vmatmul.msk.f32.vlgmr.msra.gmra.mxu3 %vm1307_vm6, %v1301_v59 }
 0x2a6   : > { %2798 = vmatpush.xpose.msk.msrb.mxu3 %vm1307_vm6, %v1050_v55  ;;  %2789 = vmatmul.msk.f32.vlgmr.msra.gmra.mxu1 %vm1307_vm6, %v1299_v53 }
 0x2a7   : > { %2794 = vmatpush.xpose.msk.msrb.mxu1 %vm1307_vm6, %v998_v52  ;;  %2796 = vmatpush.xpose.msk.msrb.mxu2 %vm1307_vm6, %v1048_v58 }
 0x2ab   : > { %2800 = vmatpush.xpose.msk.msra.mxu1 %vm1307_vm6, %v1052_v60  ;;  %2802 = vmatpush.xpose.msk.msra.mxu2 %vm1307_vm6, %v1054_v62 }
 0x2ac   : > { %2797 = vmatmul.msk.f32.vlgmr.msrb.gmra.mxu2 %vm1307_vm6, %v1303_v63 }
 0x2ad   : > { %2799 = vmatmul.msk.f32.vlgmr.msrb.gmra.mxu3 %vm1307_vm6, %v1304_v1 }
 0x2ae   : > { %2795 = vmatmul.msk.f32.vlgmr.msrb.gmra.mxu1 %vm1307_vm6, %v1302_v0 }
 0x2b4   : > { %2803 = vmatmul.msk.f32.vlgmr.msra.gmra.mxu2 %vm1307_vm6, %v1306_v2 }
 0x2b6   : > { %2801 = vmatmul.msk.f32.vlgmr.msra.gmra.mxu1 %vm1307_vm6, %v1305_v3 }
 0x2e2   : > { %v3005_v5 = vpop.permute.xlu2 %3004 }
 0x2e3   : > { %v3007_v6 = vunpack.i.h.bf16 %v3005_v5  ;;  %v3006_v7 = vunpack.i.l.bf16 %v3005_v5 }
 0x2e5   : > { %v1149_v13 = vrot.slane %v3007_v6, 4  ;;  %v1081_v20 = vrot.slane %v3006_v7, 4 }
 0x2f1   : > { %v3000_v4 = vpop.permute.xlu1 %2999 }
 0x2f2   : > { %v3002_v14 = vunpack.i.h.bf16 %v3000_v4  ;;  %v3001_v15 = vunpack.i.l.bf16 %v3000_v4 }
 0x2f4   : > { %v1093_v21 = vrot.slane %v3002_v14, 4  ;;  %v1137_v22 = vrot.slane %v3001_v15, 4 }
 0x2f9   : > { %v3015_v8 = vpop.permute.xlu1 %3014 }
 0x2fa   : > { %v3017_v9 = vunpack.i.h.bf16 %v3015_v8  ;;  %v3016_v10 = vunpack.i.l.bf16 %v3015_v8 }
 0x2fc   : > { %v1147_v11 = vrot.slane %v3017_v9, 4  ;;  %v1079_v12 = vrot.slane %v3016_v10, 4  ;;  %v1150_v16 = vsel %vm835_vm5, %v3017_v9, %v1149_v13  ;;  %v1082_v17 = vsel %vm835_vm5, %v3016_v10, %v1081_v20 }
 0x2fd   : > { %v1158_v23 = vperm.slane %v1150_v16, %v3815_v51  ;;  %v1090_v24 = vperm.slane %v1082_v17, %v3815_v51 }
 0x2fe   : > { %v1148_v18 = vsel %vm835_vm5, %v1147_v11, %v3007_v6  ;;  %v1080_v19 = vsel %vm835_vm5, %v1079_v12, %v3006_v7 }
 0x2ff   : > { %v1154_v26 = vperm.slane %v1148_v18, %v3815_v51  ;;  %v1086_v37 = vperm.slane %v1080_v19, %v3815_v51  ;;  %v1171_v33 = vrot.slane %v1158_v23, 4  ;;  %v1117_v34 = vrot.slane %v1090_v24, 4 }
 0x301   : > { %v1159_v38 = vrot.slane %v1154_v26, 4  ;;  %v1105_v39 = vrot.slane %v1086_v37, 4 }
 0x302   : > { %v3010_v25 = vpop.permute.xlu0 %3009 }
 0x303   : > { %v3012_v27 = vunpack.i.h.bf16 %v3010_v25  ;;  %v3011_v28 = vunpack.i.l.bf16 %v3010_v25 }
 0x305   : > { %v1091_v29 = vrot.slane %v3012_v27, 4  ;;  %v1094_v30 = vsel %vm835_vm5, %v3012_v27, %v1093_v21  ;;  %v1135_v31 = vrot.slane %v3011_v28, 4  ;;  %v1138_v32 = vsel %vm835_vm5, %v3011_v28, %v1137_v22 }
 0x306   : > { %v1102_v35 = vperm.slane %v1094_v30, %v3815_v51  ;;  %v1146_v36 = vperm.slane %v1138_v32, %v3815_v51 }
 0x307   : > { %v1092_v40 = vsel %vm835_vm5, %v1091_v29, %v3002_v14  ;;  %v1136_v41 = vsel %vm835_vm5, %v1135_v31, %v3001_v15 }
 0x308   : > { %v1098_v42 = vperm.slane %v1092_v40, %v3815_v51  ;;  %v1115_v44 = vrot.slane %v1102_v35, 4  ;;  %v1118_v45 = vsel %vm835_vm5, %v1102_v35, %v1117_v34  ;;  %v1142_v46 = vperm.slane %v1136_v41, %v3815_v51 }
 0x309   : > { %v1126_v47 = vperm.slane %v1118_v45, %v3823_v61  ;;  %v1172_v48 = vsel %vm835_vm5, %v1171_v33, %v1146_v36  ;;  %v1173_v49 = vrot.slane %v1146_v36, 4 }
 0x30a   : > { %v1103_v43 = vrot.slane %v1098_v42, 4  ;;  %v1106_v50 = vsel %vm835_vm5, %v1098_v42, %v1105_v39  ;;  %v1116_v52 = vsel %vm835_vm5, %v1115_v44, %v1090_v24  ;;  %v1160_v53 = vsel %vm835_vm5, %v1159_v38, %v1142_v46 }
 0x30b   : > { %v1114_v54 = vperm.slane %v1106_v50, %v3823_v61  ;;  %v1122_v55 = vperm.slane %v1116_v52, %v3823_v61  ;;  %v1133_v56 = vrot.slane %v1126_v47, 4  ;;  %v1161_v57 = vrot.slane %v1142_v46, 4 }
 0x30c   : > { %v1104_v58 = vsel %vm835_vm5, %v1103_v43, %v1086_v37  ;;  %v1166_v59 = vperm.slane %v1160_v53, %v3823_v61  ;;  %v1174_v60 = vsel %vm835_vm5, %v1158_v23, %v1173_v49  ;;  %v1178_v62 = vperm.slane %v1172_v48, %v3823_v61 }
 0x30d   : > { %v1110_v63 = vperm.slane %v1104_v58, %v3823_v61  ;;  %v1129_v0 = vrot.slane %v1114_v54, 4  ;;  %v1131_v1 = vrot.slane %v1122_v55, 4  ;;  %v1134_v2 = vsel %vm835_vm5, 0.0, %v1133_v56 }
 0x30e   : > { %v1162_v3 = vsel %vm835_vm5, %v1154_v26, %v1161_v57  ;;  %v1182_v4 = vperm.slane %v1174_v60, %v3823_v61  ;;  %v1183_v5 = vrot.slane %v1166_v59, 4  ;;  %v1187_v6 = vrot.slane %v1178_v62, 4 }
 0x30f   : > { %v1127_v7 = vrot.slane %v1110_v63, 4  ;;  %v1130_v8 = vsel %vm835_vm5, 0.0, %v1129_v0  ;;  %v1132_v9 = vsel %vm835_vm5, 0.0, %v1131_v1  ;;  %v1170_v10 = vperm.slane %v1162_v3, %v3823_v61 }
 0x310   : > { %v1188_v11 = vsel %vm835_vm5, 0.0, %v1187_v6  ;;  %v1189_v12 = vrot.slane %v1182_v4, 4  ;;  %v1243_v13 = vrot.slane %v1132_v9, 4  ;;  %v1249_v20 = vrot.slane %v1134_v2, 4 }
 0x311   : > { %v1185_v14 = vrot.slane %v1170_v10, 4  ;;  %v1255_v15 = vrot.slane %v1188_v11, 4  ;;  %v1191_v16 = vsel %vm835_vm5, %v1131_v1, %v1110_v63  ;;  %v1196_v17 = vsel %vm835_vm5, %v1133_v56, %v1114_v54 }
 0x312   : > { %v1190_v18 = vsel %vm835_vm5, 0.0, %v1189_v12  ;;  %v1195_v19 = vperm.slane %v1191_v16, %v3815_v51  ;;  %v1200_v21 = vperm.slane %v1196_v17, %v3815_v51  ;;  %v1201_v22 = vsel %vm835_vm5, %v1187_v6, %v1166_v59 }
 0x313   : > { %v1261_v23 = vrot.slane %v1190_v18, 4  ;;  %v1205_v24 = vperm.slane %v1201_v22, %v3815_v51  ;;  %v1206_v25 = vsel %vm835_vm5, %v1189_v12, %v1170_v10  ;;  %v1128_v26 = vsel %vm835_vm5, 0.0, %v1127_v7 }
 0x314   : > { %v1210_v37 = vperm.slane %v1206_v25, %v3815_v51  ;;  %v1211_v27 = vrot.slane %v1200_v21, 4  ;;  %v1213_v28 = vrot.slane %v1195_v19, 4  ;;  %v1184_v29 = vsel %vm835_vm5, 0.0, %v1183_v5 }
 0x315   : > { %v1225_v30 = vrot.slane %v1205_v24, 4  ;;  %v1186_v31 = vsel %vm835_vm5, 0.0, %v1185_v14  ;;  %v1244_v32 = vsel %vm835_vm5, %v1243_v13, %v1128_v26  ;;  %v1250_v33 = vsel %vm835_vm5, %v1249_v20, %v1130_v8 }
 0x316   : > { %v1212_v34 = vsel %vm835_vm5, %v1211_v27, %v1195_v19  ;;  %v1223_v35 = vrot.slane %v1210_v37, 4  ;;  %v1214_v36 = vsel %vm835_vm5, %v1200_v21, %v1213_v28  ;;  %v1248_v38 = vperm.slane %v1244_v32, %v3815_v51  ;;  %v1516_v32 = vld [vmem:[#allocation3] sm:$0xff] }
 0x317   : > { %v1218_v39 = vperm.slane %v1212_v34, %v3823_v61  ;;  %v1222_v40 = vperm.slane %v1214_v36, %v3823_v61  ;;  %v1226_v41 = vsel %vm835_vm5, %v1210_v37, %v1225_v30  ;;  %v1254_v42 = vperm.slane %v1250_v33, %v3815_v51 }
 0x318   : > { %v1224_v44 = vsel %vm835_vm5, %v1223_v35, %v1205_v24  ;;  %v1234_v45 = vperm.slane %v1226_v41, %v3823_v61  ;;  %v1256_v46 = vsel %vm835_vm5, %v1255_v15, %v1184_v29  ;;  %v1262_v47 = vsel %vm835_vm5, %v1261_v23, %v1186_v31  ;;  %v1517_v35 = vld [vmem:[#allocation3 + $0x8] sm:$0xff] }
 0x319   : > { %v1230_v48 = vperm.slane %v1224_v44, %v3823_v61  ;;  %v1237_v49 = vrot.slane %v1218_v39, 4  ;;  %v1241_v43 = vrot.slane %v1222_v40, 4  ;;  %v1260_v50 = vperm.slane %v1256_v46, %v3815_v51  ;;  %v1518_v44 = vld [vmem:[#allocation3 + $0x10] sm:$0xff] }
 0x31a   : > { %v1239_v52 = vrot.slane %v1234_v45, 4  ;;  %v1266_v53 = vperm.slane %v1262_v47, %v3815_v51  ;;  %v1267_v54 = vrot.slane %v1254_v42, 4  ;;  %v1269_v55 = vrot.slane %v1248_v38, 4 }
 0x31b   : > { %v1235_v56 = vrot.slane %v1230_v48, 4  ;;  %v1238_v57 = vsel %vm835_vm5, %v1230_v48, %v1237_v49  ;;  %v1242_v58 = vsel %vm835_vm5, %v1234_v45, %v1241_v43  ;;  %v1281_v59 = vrot.slane %v1260_v50, 4 }
 0x31c   : > { %1798 = vmatpush.msrb.mxu0 %v1238_v57  ;;  %v1240_v60 = vsel %vm835_vm5, %v1239_v52, %v1222_v40  ;;  %1844 = vmatpush.msrb.mxu2 %v1242_v58  ;;  %v1268_v62 = vsel %vm835_vm5, %v1267_v54, %v1248_v38  ;;  %v1279_v63 = vrot.slane %v1266_v53, 4  ;;  %v1270_v0 = vsel %vm835_vm5, %v1254_v42, %v1269_v55  ;;  %v1520_v42 = vld [vmem:[#allocation3 + $0x20] sm:$0xff]  ;;  %v4042_v54 = vld [vmem:[#allocation3 + $0x38] sm:$0xff]  ;;  %v4044_v55 = vld [vmem:[#allocation3 + $0x28] sm:$0xff] }
 0x31d   : > { %1821 = vmatpush.msrb.mxu1 %v1240_v60  ;;  %v1236_v1 = vsel %vm835_vm5, %v1235_v56, %v1218_v39  ;;  %v1274_v2 = vperm.slane %v1268_v62, %v3823_v61  ;;  %v1278_v3 = vperm.slane %v1270_v0, %v3823_v61  ;;  %v1282_v4 = vsel %vm835_vm5, %v1266_v53, %v1281_v59  ;;  %v1519_v39 = vld [vmem:[#allocation3 + $0x18] sm:$0xff]  ;;  %v4040_v53 = vld [vmem:[#allocation3 + $0x30] sm:$0xff] }
 0x31e   : > { %1775 = vmatpush.msra.mxu3 %v1236_v1  ;;  %v1280_v5 = vsel %vm835_vm5, %v1279_v63, %v1260_v50  ;;  %v1290_v6 = vperm.slane %v1282_v4, %v3823_v61  ;;  %v3386_v31 = vmov 0  }
 0x31f   : > { %v1286_v7 = vperm.slane %v1280_v5, %v3823_v61  ;;  %v1293_v8 = vrot.slane %v1274_v2, 4  ;;  %v1297_v9 = vrot.slane %v1278_v3, 4  ;;  %3018 = vset.pattern.permute.xlu0 %v3386_v31  ;;  %3019 = vset.pattern.permute.xlu1 %v3386_v31 }
 0x320   : > { %v1295_v10 = vrot.slane %v1290_v6, 4  ;;  %3020 = vset.pattern.permute.xlu2 %v3386_v31 }
 0x321   : > { %v1294_v11 = vsel %vm835_vm5, %v1286_v7, %v1293_v8  ;;  %v1291_v12 = vrot.slane %v1286_v7, 4  ;;  %v1298_v13 = vsel %vm835_vm5, %v1290_v6, %v1297_v9 }
 0x322   : > { %1890 = vmatpush.msra.mxu0 %v1294_v11  ;;  %v1296_v20 = vsel %vm835_vm5, %v1295_v10, %v1278_v3  ;;  %1936 = vmatpush.msra.mxu2 %v1298_v13 }
 0x323   : > { %1913 = vmatpush.msra.mxu1 %v1296_v20  ;;  %v1292_v14 = vsel %vm835_vm5, %v1291_v12, %v1274_v2  ;;  %v4003_v15 = vpop.f32.mrf.mxu1 }
 0x324   : > { %1867 = vmatpush.msrb.mxu3 %v1292_v14  ;;  %v1524_v16 = vsel %vm1307_vm6, %v4003_v15, -inf }
 0x325   : > { %1525 = vmax.xlane.f32.xlu0 %v1524_v16 }
 0x327   : > { %v4007_v17 = vpop.f32.mrf.mxu2 }
 0x328   : > { %v1527_v18 = vsel %vm1307_vm6, %v4007_v17, -inf  ;;  %v4013_v21 = vpop.f32.mrf.mxu3 }
 0x329   : > { %1528 = vmax.xlane.f32.xlu2 %v1527_v18  ;;  %v1530_v23 = vsel %vm1307_vm6, %v4013_v21, -inf }
 0x32b   : > { %v4011_v19 = vpop.f32.mrf.mxu1 }
 0x32c   : > { %v1533_v22 = vsel %vm1307_vm6, %v4011_v19, -inf }
 0x32d   : > { %1534 = vmax.xlane.f32.xlu1 %v1533_v22 }
 0x32f   : > { %v4019_v24 = vpop.f32.mrf.mxu2 }
 0x330   : > { %v1536_v25 = vsel %vm1307_vm6, %v4019_v24, -inf  ;;  %v4025_v37 = vpop.f32.mrf.mxu3 }
 0x331   : > { %1537 = vmax.xlane.f32.xlu0 %v1536_v25  ;;  %1531 = vmax.xlane.f32.xlu2 %v1530_v23  ;;  %v1539_v29 = vsel %vm1307_vm6, %v4025_v37, -inf }
 0x333   : > { %v4023_v26 = vpop.f32.mrf.mxu1 }
 0x334   : > { %v1542_v27 = vsel %vm1307_vm6, %v4023_v26, -inf }
 0x337   : > { %v4029_v28 = vpop.f32.mrf.mxu2 }
 0x338   : > { %v1545_v30 = vsel %vm1307_vm6, %v4029_v28, -inf }
 0x339   : > { %1543 = vmax.xlane.f32.xlu0 %v1542_v27  ;;  %1546 = vmax.xlane.f32.xlu1 %v1545_v30 }
 0x33a   : > { %1540 = vmax.xlane.f32.xlu2 %v1539_v29 }
 0x398   : > { %v1526_v33 = vpop.xlane.xlu0 %1525 }
 0x399   : > { %v1548_v34 = vmax.f32 %v1516_v32, %v1526_v33 }
 0x39b   : > { %1957 = vst.msk [vmem:[#allocation3] sm:$0xff] %vm1692_vm7, %v1548_v34  ;;  %1582 = vperm.xlu0 %3018, %v1548_v34   ;;  %v1556_v48 = vsub.f32 %v1516_v32, %v1548_v34 }
 0x39c   : > { %v1529_v36 = vpop.xlane.xlu2 %1528 }
 0x39d   : > { %v1549_v38 = vmax.f32 %v1517_v35, %v1529_v36  ;;  %v1564_v50 = vmul.f32 1.442695, %v1556_v48 }
 0x39f   : > { %1958 = vst.msk [vmem:[#allocation3 + $0x8] sm:$0xff] %vm1692_vm7, %v1549_v38  ;;  %1587 = vperm.xlu1 %3019, %v1549_v38   ;;  %v1557_v43 = vsub.f32 %v1517_v35, %v1549_v38  ;;  %3021 = vpow2.f32 %v1564_v50 }
 0x3a0   : > { %v1535_v40 = vpop.xlane.xlu1 %1534 }
 0x3a1   : > { %v1551_v41 = vmax.f32 %v1519_v39, %v1535_v40  ;;  %v1566_v56 = vmul.f32 1.442695, %v1557_v43 }
 0x3a3   : > { %1960 = vst.msk [vmem:[#allocation3 + $0x18] sm:$0xff] %vm1692_vm7, %v1551_v41  ;;  %1597 = vperm.xlu2 %3020, %v1551_v41   ;;  %v1559_v1 = vsub.f32 %v1519_v39, %v1551_v41  ;;  %3023 = vpow2.f32 %v1566_v56 }
 0x3a4   : > { %v1538_v45 = vpop.xlane.xlu0 %1537  ;;  %v1532_v46 = vpop.xlane.xlu2 %1531 }
 0x3a5   : > { %v1552_v47 = vmax.f32 %v1520_v42, %v1538_v45  ;;  %v1550_v49 = vmax.f32 %v1518_v44, %v1532_v46  ;;  %v1570_v6 = vmul.f32 1.442695, %v1559_v1  ;;  %v4070_v7 = vpop.eup %3021 }
 0x3a7   : > { %1961 = vst.msk [vmem:[#allocation3 + $0x20] sm:$0xff] %vm1692_vm7, %v1552_v47  ;;  %1602 = vperm.xlu1 %3019, %v1552_v47   ;;  %v1558_v52 = vsub.f32 %v1518_v44, %v1550_v49  ;;  %v1560_v4 = vsub.f32 %v1520_v42, %v1552_v47 }
 0x3a8   : > { %1959 = vst.msk [vmem:[#allocation3 + $0x10] sm:$0xff] %vm1692_vm7, %v1550_v49 }
 0x3a9   : > { %v1568_v63 = vmul.f32 1.442695, %v1558_v52  ;;  %v1572_v8 = vmul.f32 1.442695, %v1560_v4  ;;  %v4072_v9 = vpop.eup %3023 }
 0x3ab   : > { %1592 = vperm.xlu2 %3020, %v1550_v49   ;;  %3025 = vpow2.f32 %v1568_v63 }
 0x3ac   : > { %v1544_v57 = vpop.xlane.xlu0 %1543  ;;  %v1547_v58 = vpop.xlane.xlu1 %1546  ;;  %3027 = vpow2.f32 %v1570_v6  ;;  %v1646_v6 = vld [vmem:[#allocation4 + $0x10] sm:$0xff] }
 0x3ad   : > { %v4047_v59 = vmax.f32 %v4040_v53, %v1544_v57  ;;  %v4050_v60 = vmax.f32 %v4042_v54, %v1547_v58  ;;  %v1541_v62 = vpop.xlane.xlu2 %1540  ;;  %3029 = vpow2.f32 %v1572_v8 }
 0x3ae   : > { %v4053_v0 = vmax.f32 %v4044_v55, %v1541_v62 }
 0x3af   : > { %v1562_v2 = vsub.f32 %v4040_v53, %v4047_v59  ;;  %1963 = vst.msk [vmem:[#allocation3 + $0x30] sm:$0xff] %vm1692_vm7, %v4047_v59  ;;  %v1563_v3 = vsub.f32 %v4042_v54, %v4050_v60  ;;  %1612 = vperm.xlu1 %3019, %v4047_v59   ;;  %1617 = vperm.xlu0 %3018, %v4050_v60  }
 0x3b0   : > { %1964 = vst.msk [vmem:[#allocation3 + $0x38] sm:$0xff] %vm1692_vm7, %v4050_v60  ;;  %v1561_v5 = vsub.f32 %v4044_v55, %v4053_v0  ;;  %v1704_v55 = vld [vmem:[#allocation5 + $0x18] sm:$0xff] }
 0x3b1   : > { %1962 = vst.msk [vmem:[#allocation3 + $0x28] sm:$0xff] %vm1692_vm7, %v4053_v0  ;;  %v4076_v10 = vpop.eup %3025  ;;  %v1576_v54 = vmul.f32 1.442695, %v1562_v2 }
 0x3b2   : > { %v4079_v11 = vpop.eup %3027  ;;  %v1574_v60 = vmul.f32 1.442695, %v1561_v5  ;;  %v1654_v53 = vmul.f32 %v4076_v10, %v1646_v6  ;;  %v1649_v5 = vld [vmem:[#allocation4 + $0x28] sm:$0xff] }
 0x3b3   : > { %1607 = vperm.xlu2 %3020, %v4053_v0   ;;  %v4081_v12 = vpop.eup %3029 }
 0x3b7   : > { %1711 = vperm.xlu1 %3019, %v4070_v7   ;;  %1716 = vperm.xlu0 %3018, %v4072_v9  }
 0x3bb   : > { %1721 = vperm.xlu2 %3020, %v4076_v10  }
 0x3bf   : > { %1731 = vperm.xlu1 %3019, %v4081_v12   ;;  %1726 = vperm.xlu0 %3018, %v4079_v11  }
 0x3fd   : > { %v1598_v13 = vpop.permute.xlu2 %1597 }
 0x3fe   : > { %v1623_v20 = vsub.f32 %v4011_v19, %v1598_v13  ;;  %v1703_v13 = vld [vmem:[#allocation5 + $0x10] sm:$0xff] }
 0x400   : > { %v1634_v14 = vmul.f32 1.442695, %v1623_v20  ;;  %v1644_v20 = vld [vmem:[#allocation4] sm:$0xff] }
 0x402   : > { %3031 = vpow2.f32 %v1634_v14 }
 0x405   : > { %v1593_v16 = vpop.permute.xlu2 %1592 }
 0x406   : > { %v1622_v18 = vsub.f32 %v4013_v21, %v1593_v16 }
 0x408   : > { %v3032_v22 = vpop.eup %3031  ;;  %v1632_v23 = vmul.f32 1.442695, %v1622_v18 }
 0x409   : > { %2807 = vmatmul.msk.f32.vlgmr.msrb.gmra.mxu2 %vm1307_vm6, %v3032_v22 }
 0x40a   : > { %3033 = vpow2.f32 %v1632_v23 }
 0x40d   : > { %v1608_v25 = vpop.permute.xlu2 %1607  ;;  %v1583_v27 = vpop.permute.xlu0 %1582 }
 0x40e   : > { %v1625_v29 = vsub.f32 %v4025_v37, %v1608_v25  ;;  %v1620_v30 = vsub.f32 %v4003_v15, %v1583_v27  ;;  %v1652_v25 = vmul.f32 %v4070_v7, %v1644_v20  ;;  %v1647_v7 = vld [vmem:[#allocation4 + $0x18] sm:$0xff] }
 0x410   : > { %v3034_v31 = vpop.eup %3033  ;;  %v1638_v32 = vmul.f32 1.442695, %v1625_v29  ;;  %v1628_v33 = vmul.f32 1.442695, %v1620_v30  ;;  %v1645_v29 = vld [vmem:[#allocation4 + $0x8] sm:$0xff] }
 0x411   : > { %2806 = vmatmul.msk.f32.vlgmr.msrb.gmra.mxu1 %vm1307_vm6, %v3034_v31  ;;  %v1588_v19 = vpop.permute.xlu1 %1587  ;;  %v1666_v34 = vsel %vm1307_vm6, %v3034_v31, 0.0 }
 0x412   : > { %3035 = vpow2.f32 %v1638_v32  ;;  %v1621_v21 = vsub.f32 %v4007_v17, %v1588_v19  ;;  %1667 = vadd.xlane.f32.xlu1 %v1666_v34  ;;  %v1653_v19 = vmul.f32 %v4072_v9, %v1645_v29 }
 0x413   : > { %3037 = vpow2.f32 %v1628_v33 }
 0x414   : > { %v1630_v35 = vmul.f32 1.442695, %v1621_v21 }
 0x415   : > { %v1722_v0 = vpop.permute.xlu2 %1721 }
 0x416   : > { %3039 = vpow2.f32 %v1630_v35  ;;  %v1655_v35 = vmul.f32 %v4079_v11, %v1647_v7 }
 0x418   : > { %v3036_v36 = vpop.eup %3035 }
 0x419   : > { %v3038_v38 = vpop.eup %3037  ;;  %v1603_v37 = vpop.permute.xlu1 %1602  ;;  %v1675_v15 = vsel %vm1307_vm6, %v3036_v36, 0.0 }
 0x41a   : > { %2804 = vmatmul.msk.f32.vlgmr.msra.gmra.mxu3 %vm1307_vm6, %v3038_v38  ;;  %v1624_v39 = vsub.f32 %v4019_v24, %v1603_v37  ;;  %1676 = vadd.xlane.f32.xlu1 %v1675_v15  ;;  %v1660_v40 = vsel %vm1307_vm6, %v3038_v38, 0.0  ;;  %v1669_v24 = vsel %vm1307_vm6, %v3032_v22, 0.0  ;;  %v1751_v22 = vmul.f32 %v1722_v0, %v1703_v13  ;;  %v1702_v38 = vld [vmem:[#allocation5 + $0x8] sm:$0xff] }
 0x41b   : > { %1661 = vadd.xlane.f32.xlu0 %v1660_v40 }
 0x41c   : > { %v3040_v41 = vpop.eup %3039  ;;  %v1636_v42 = vmul.f32 1.442695, %v1624_v39 }
 0x41d   : > { %2805 = vmatmul.msk.f32.vlgmr.msrb.gmra.mxu0 %vm1307_vm6, %v3040_v41  ;;  %v1663_v17 = vsel %vm1307_vm6, %v3040_v41, 0.0  ;;  %v1701_v41 = vld [vmem:[#allocation5] sm:$0xff] }
 0x41e   : > { %3041 = vpow2.f32 %v1636_v42  ;;  %1664 = vadd.xlane.f32.xlu2 %v1663_v17 }
 0x421   : > { %v1618_v44 = vpop.permute.xlu0 %1617  ;;  %v1613_v45 = vpop.permute.xlu1 %1612 }
 0x422   : > { %v1627_v46 = vsub.f32 %v4029_v28, %v1618_v44  ;;  %v1626_v47 = vsub.f32 %v4023_v26, %v1613_v45  ;;  %v1578_v28 = vmul.f32 1.442695, %v1563_v3 }
 0x423   : > { %1670 = vadd.xlane.f32.xlu0 %v1669_v24  ;;  %v1650_v24 = vld [vmem:[#allocation4 + $0x30] sm:$0xff] }
 0x424   : > { %v3042_v48 = vpop.eup %3041  ;;  %v1642_v49 = vmul.f32 1.442695, %v1627_v46  ;;  %v1640_v43 = vmul.f32 1.442695, %v1626_v47  ;;  %v1651_v46 = vld [vmem:[#allocation4 + $0x38] sm:$0xff] }
 0x425   : > { %2808 = vmatmul.msk.f32.vlgmr.msrb.gmra.mxu3 %vm1307_vm6, %v3042_v48  ;;  %2809 = vmatmul.msk.f32.vlgmr.msra.gmra.mxu0 %vm1307_vm6, %v3036_v36  ;;  %v1672_v50 = vsel %vm1307_vm6, %v3042_v48, 0.0  ;;  %v1648_v36 = vld [vmem:[#allocation4 + $0x20] sm:$0xff] }
 0x426   : > { %3043 = vpow2.f32 %v1642_v49  ;;  %1673 = vadd.xlane.f32.xlu2 %v1672_v50  ;;  %v1656_v39 = vmul.f32 %v4081_v12, %v1648_v36 }
 0x427   : > { %3045 = vpow2.f32 %v1640_v43 }
 0x428   : > { %3047 = vpow2.f32 %v1578_v28 }
 0x429   : > { %3049 = vpow2.f32 %v1576_v54  ;;  %v1712_v1 = vpop.permute.xlu1 %1711  ;;  %v1717_v3 = vpop.permute.xlu0 %1716 }
 0x42a   : > { %3051 = vpow2.f32 %v1574_v60  ;;  %v1750_v40 = vmul.f32 %v1717_v3, %v1702_v38  ;;  %v1749_v45 = vmul.f32 %v1712_v1, %v1701_v41 }
 0x42c   : > { %v3044_v26 = vpop.eup %3043 }
 0x42d   : > { %v3046_v52 = vpop.eup %3045  ;;  %2811 = vmatmul.msk.f32.vlgmr.msra.gmra.mxu2 %vm1307_vm6, %v3044_v26  ;;  %v1681_v56 = vsel %vm1307_vm6, %v3044_v26, 0.0  ;;  %v1705_v26 = vld [vmem:[#allocation5 + $0x20] sm:$0xff] }
 0x42e   : > { %2810 = vmatmul.msk.f32.vlgmr.msra.gmra.mxu1 %vm1307_vm6, %v3046_v52  ;;  %1682 = vadd.xlane.f32.xlu2 %v1681_v56  ;;  %v1678_v57 = vsel %vm1307_vm6, %v3046_v52, 0.0  ;;  %v4112_v58 = vpop.eup %3047  ;;  %v1706_v56 = vld [vmem:[#allocation5 + $0x28] sm:$0xff] }
 0x42f   : > { %1679 = vadd.xlane.f32.xlu0 %v1678_v57  ;;  %v4121_v62 = vpop.eup %3049  ;;  %v1659_v12 = vmul.f32 %v4112_v58, %v1651_v46 }
 0x430   : > { %v3052_v63 = vpop.eup %3051  ;;  %v1658_v49 = vmul.f32 %v4121_v62, %v1650_v24 }
 0x431   : > { %v4124_v4 = vpop.permute.xlu1 %1731  ;;  %v1727_v2 = vpop.permute.xlu0 %1726  ;;  %v1657_v18 = vmul.f32 %v3052_v63, %v1649_v5 }
 0x432   : > { %v1752_v14 = vmul.f32 %v1727_v2, %v1704_v55  ;;  %v1753_v52 = vmul.f32 %v4124_v4, %v1705_v26  ;;  %v1707_v2 = vld [vmem:[#allocation5 + $0x30] sm:$0xff] }
 0x433   : > { %1746 = vperm.xlu1 %3019, %v4112_v58   ;;  %v1708_v58 = vld [vmem:[#allocation5 + $0x38] sm:$0xff] }
 0x443   : > { %1741 = vperm.xlu0 %3018, %v4121_v62  }
 0x446   : > { %1736 = vperm.xlu2 %3020, %v3052_v63  }
 0x485   : > { %v1668_v59 = vpop.xlane.xlu1 %1667 }
 0x486   : > { %v1686_v8 = vadd.f32 %v1668_v59, %v1654_v53 }
 0x488   : > { %1695 = vst.msk [vmem:[#allocation4 + $0x10] sm:$0xff] %vm1692_vm7, %v1686_v8 }
 0x48c   : > { %v1846_v16 = vpop.f32.mrf.mxu2 }
 0x48d   : > { %v1944_v23 = vadd.f32 %v1846_v16, %v1752_v14  ;;  %v1677_v27 = vpop.xlane.xlu1 %1676 }
 0x48e   : > { %v1662_v10 = vpop.xlane.xlu0 %1661  ;;  %v1689_v30 = vadd.f32 %v1677_v27, %v1657_v18  ;;  %v1823_v31 = vpop.f32.mrf.mxu1 }
 0x48f   : > { %1952 = vst.msk [vmem:[#allocation5 + $0x18] sm:$0xff] %vm1307_vm6, %v1944_v23  ;;  %v1684_v32 = vadd.f32 %v1662_v10, %v1652_v25  ;;  %v1943_v33 = vadd.f32 %v1823_v31, %v1751_v22 }
 0x490   : > { %1698 = vst.msk [vmem:[#allocation4 + $0x28] sm:$0xff] %vm1692_vm7, %v1689_v30 }
 0x491   : > { %1693 = vst.msk [vmem:[#allocation4] sm:$0xff] %vm1692_vm7, %v1684_v32  ;;  %v1665_v34 = vpop.xlane.xlu2 %1664 }
 0x492   : > { %1951 = vst.msk [vmem:[#allocation5 + $0x10] sm:$0xff] %vm1307_vm6, %v1943_v33  ;;  %v1685_v21 = vadd.f32 %v1665_v34, %v1653_v19 }
 0x494   : > { %1694 = vst.msk [vmem:[#allocation4 + $0x8] sm:$0xff] %vm1692_vm7, %v1685_v21 }
 0x496   : > { %v1671_v37 = vpop.xlane.xlu0 %1670 }
 0x497   : > { %v1687_v15 = vadd.f32 %v1671_v37, %v1655_v35 }
 0x499   : > { %1696 = vst.msk [vmem:[#allocation4 + $0x18] sm:$0xff] %vm1692_vm7, %v1687_v15  ;;  %v1674_v9 = vpop.xlane.xlu2 %1673 }
 0x49a   : > { %v1688_v42 = vadd.f32 %v1674_v9, %v1656_v39  ;;  %v1800_v17 = vpop.f32.mrf.mxu0 }
 0x49b   : > { %v1942_v44 = vadd.f32 %v1800_v17, %v1750_v40 }
 0x49c   : > { %1697 = vst.msk [vmem:[#allocation4 + $0x20] sm:$0xff] %vm1692_vm7, %v1688_v42 }
 0x49d   : > { %1950 = vst.msk [vmem:[#allocation5 + $0x8] sm:$0xff] %vm1307_vm6, %v1942_v44  ;;  %v1777_v11 = vpop.f32.mrf.mxu3 }
 0x49e   : > { %v1941_v47 = vadd.f32 %v1777_v11, %v1749_v45 }
 0x4a0   : > { %1949 = vst.msk [vmem:[#allocation5] sm:$0xff] %vm1307_vm6, %v1941_v47 }
 0x4a1   : > { %v1683_v48 = vpop.xlane.xlu2 %1682 }
 0x4a2   : > { %v1691_v43 = vadd.f32 %v1683_v48, %v1659_v12  ;;  %v1680_v50 = vpop.xlane.xlu0 %1679  ;;  %v1892_v1 = vpop.f32.mrf.mxu0 }
 0x4a3   : > { %v1690_v28 = vadd.f32 %v1680_v50, %v1658_v49 }
 0x4a4   : > { %1700 = vst.msk [vmem:[#allocation4 + $0x38] sm:$0xff] %vm1692_vm7, %v1691_v43 }
 0x4a5   : > { %1699 = vst.msk [vmem:[#allocation4 + $0x30] sm:$0xff] %vm1692_vm7, %v1690_v28  ;;  %v1747_v62 = vpop.permute.xlu1 %1746 }
 0x4a6   : > { %v1756_v6 = vmul.f32 %v1747_v62, %v1708_v58 }
 0x4a8   : > { %v1869_v57 = vpop.f32.mrf.mxu3 }
 0x4a9   : > { %v1945_v54 = vadd.f32 %v1869_v57, %v1753_v52  ;;  %v1737_v60 = vpop.permute.xlu2 %1736 }
 0x4aa   : > { %v1754_v63 = vmul.f32 %v1737_v60, %v1706_v56 }
 0x4ab   : > { %1953 = vst.msk [vmem:[#allocation5 + $0x20] sm:$0xff] %vm1307_vm6, %v1945_v54  ;;  %v1915_v55 = vpop.f32.mrf.mxu1 }
 0x4ac   : > { %v1946_v3 = vadd.f32 %v1892_v1, %v1754_v63 }
 0x4ae   : > { %1954 = vst.msk [vmem:[#allocation5 + $0x28] sm:$0xff] %vm1307_vm6, %v1946_v3 }
 0x4b0   : > { %v1938_v53 = vpop.f32.mrf.mxu2 }
 0x4b1   : > { %v1948_v59 = vadd.f32 %v1938_v53, %v1756_v6 }
 0x4b3   : > { %1956 = vst.msk [vmem:[#allocation5 + $0x38] sm:$0xff] %vm1307_vm6, %v1948_v59 }
 0x4b5   : > { %v1742_v4 = vpop.permute.xlu0 %1741 }
 0x4b6   : > { %v1755_v8 = vmul.f32 %v1742_v4, %v1707_v2  ;;  %1968 = sbr.rel (%p2812_p1) target bundleno = 1934 (0x78e), region = 76 }
 0x4b8   : > { %v1947_v0 = vadd.f32 %v1915_v55, %v1755_v8 }
 0x4ba   : > { %1955 = vst.msk [vmem:[#allocation5 + $0x30] sm:$0xff] %vm1307_vm6, %v1947_v0 }
 0x4bb   : > { %v1982_v5 = vld [vmem:[#allocation4 + $0x28] sm:$0xff]  ;;  %v1977_v13 = vld [vmem:[#allocation4] sm:$0xff]  ;;  %v3387_v20 = vmov 0   ;;  %v1984_v14 = vld [vmem:[#allocation4 + $0x38] sm:$0xff]  ;;  %vm2291_vm8 = vcmask 130048   ;;  %vm2294_vm9 = vcmask 195584  }
 0x4bc   : > { %3054 = vset.pattern.permute.xlu1 %v3387_v20  ;;  %3053 = vset.pattern.permute.xlu0 %v3387_v20  ;;  %3058 = vrcp.f32 %v1982_v5  ;;  %v1978_v16 = vld [vmem:[#allocation4 + $0x8] sm:$0xff]  ;;  %v1979_v18 = vld [vmem:[#allocation4 + $0x10] sm:$0xff]  ;;  %v1980_v25 = vld [vmem:[#allocation4 + $0x18] sm:$0xff]  ;;  %vm2603_vm13 = vcmask 254976  }
 0x4bd   : > { %3060 = vrcp.f32 %v1977_v13  ;;  %3055 = vset.pattern.permute.xlu2 %v3387_v20  ;;  %v1981_v29 = vld [vmem:[#allocation4 + $0x20] sm:$0xff]  ;;  %v1983_v30 = vld [vmem:[#allocation4 + $0x30] sm:$0xff]  ;;  %v1970_v21 = vld [vmem:[#allocation5 + $0x8] sm:$0xff] }
 0x4be   : > { %3062 = vrcp.f32 %v1984_v14  ;;  %v1972_v35 = vld [vmem:[#allocation5 + $0x18] sm:$0xff]  ;;  %v1969_v41 = vld [vmem:[#allocation5] sm:$0xff]  ;;  %v1974_v9 = vld [vmem:[#allocation5 + $0x28] sm:$0xff] }
 0x4bf   : > { %3064 = vrcp.f32 %v1978_v16  ;;  %v1976_v45 = vld [vmem:[#allocation5 + $0x38] sm:$0xff]  ;;  %v1971_v47 = vld [vmem:[#allocation5 + $0x10] sm:$0xff]  ;;  %v1973_v58 = vld [vmem:[#allocation5 + $0x20] sm:$0xff] }
 0x4c0   : > { %3066 = vrcp.f32 %v1979_v18 }
 0x4c1   : > { %3068 = vrcp.f32 %v1980_v25  ;;  %v1975_v53 = vld [vmem:[#allocation5 + $0x30] sm:$0xff] }
 0x4c2   : > { %v3059_v22 = vpop.eup %3058  ;;  %3070 = vrcp.f32 %v1981_v29 }
 0x4c3   : > { %v3061_v23 = vpop.eup %3060  ;;  %2020 = vperm.xlu0 %3053, %v3059_v22   ;;  %3072 = vrcp.f32 %v1983_v30 }
 0x4c4   : > { %1995 = vperm.xlu1 %3054, %v3061_v23   ;;  %v3063_v27 = vpop.eup %3062 }
 0x4c5   : > { %v3065_v10 = vpop.eup %3064 }
 0x4c6   : > { %v3067_v31 = vpop.eup %3066  ;;  %2000 = vperm.xlu2 %3055, %v3065_v10  }
 0x4c7   : > { %v3069_v32 = vpop.eup %3068 }
 0x4c8   : > { %v3071_v33 = vpop.eup %3070 }
 0x4c9   : > { %v3073_v19 = vpop.eup %3072 }
 0x4cb   : > { %2030 = vperm.xlu0 %3053, %v3063_v27  }
 0x4cc   : > { %2005 = vperm.xlu1 %3054, %v3067_v31  }
 0x4ce   : > { %2010 = vperm.xlu2 %3055, %v3069_v32  }
 0x4d3   : > { %2015 = vperm.xlu0 %3053, %v3071_v33  }
 0x4d4   : > { %2025 = vperm.xlu1 %3054, %v3073_v19  }
 0x520   : > { %v2001_v34 = vpop.permute.xlu2 %2000 }
 0x521   : > { %v2034_v36 = vmul.f32 %v2001_v34, %v1970_v21 }
 0x523   : > { %v2055_v37 = vrot.slane %v2034_v36, 4 }
 0x528   : > { %v2011_v7 = vpop.permute.xlu2 %2010 }
 0x529   : > { %v2036_v38 = vmul.f32 %v2011_v7, %v1972_v35 }
 0x52b   : > { %v2053_v40 = vrot.slane %v2036_v38, 4  ;;  %v2056_v42 = vsel %vm835_vm5, %v2036_v38, %v2055_v37 }
 0x52c   : > { %v2064_v46 = vperm.slane %v2056_v42, %v3815_v51 }
 0x52d   : > { %v2054_v44 = vsel %vm835_vm5, %v2053_v40, %v2034_v36 }
 0x52e   : > { %v2060_v12 = vperm.slane %v2054_v44, %v3815_v51  ;;  %v2077_v26 = vrot.slane %v2064_v46, 4 }
 0x530   : > { %v2065_v54 = vrot.slane %v2060_v12, 4 }
 0x535   : > { %v2021_v15 = vpop.permute.xlu0 %2020 }
 0x536   : > { %v1996_v39 = vpop.permute.xlu1 %1995  ;;  %v2038_v11 = vmul.f32 %v2021_v15, %v1974_v9 }
 0x537   : > { %v2033_v17 = vmul.f32 %v1996_v39, %v1969_v41 }
 0x538   : > { %v2111_v28 = vrot.slane %v2038_v11, 4 }
 0x539   : > { %v2043_v43 = vrot.slane %v2033_v17, 4 }
 0x53d   : > { %v2031_v24 = vpop.permute.xlu0 %2030 }
 0x53e   : > { %v2040_v48 = vmul.f32 %v2031_v24, %v1976_v45  ;;  %v2006_v49 = vpop.permute.xlu1 %2005 }
 0x53f   : > { %v2035_v50 = vmul.f32 %v2006_v49, %v1971_v47 }
 0x540   : > { %v2109_v52 = vrot.slane %v2040_v48, 4  ;;  %v2112_v60 = vsel %vm835_vm5, %v2040_v48, %v2111_v28 }
 0x541   : > { %v2041_v56 = vrot.slane %v2035_v50, 4  ;;  %v2044_v57 = vsel %vm835_vm5, %v2035_v50, %v2043_v43  ;;  %v2120_v2 = vperm.slane %v2112_v60, %v3815_v51 }
 0x542   : > { %v2052_v63 = vperm.slane %v2044_v57, %v3815_v51  ;;  %v2110_v59 = vsel %vm835_vm5, %v2109_v52, %v2038_v11 }
 0x543   : > { %v2042_v1 = vsel %vm835_vm5, %v2041_v56, %v2033_v17  ;;  %v2116_v23 = vperm.slane %v2110_v59, %v3815_v51  ;;  %v2133_v32 = vrot.slane %v2120_v2, 4 }
 0x544   : > { %v2048_v62 = vperm.slane %v2042_v1, %v3815_v51  ;;  %v2078_v3 = vsel %vm835_vm5, %v2077_v26, %v2052_v63  ;;  %v2079_v6 = vrot.slane %v2052_v63, 4 }
 0x545   : > { %v2084_v4 = vperm.slane %v2078_v3, %v3823_v61  ;;  %v2016_v8 = vpop.permute.xlu0 %2015  ;;  %v2121_v36 = vrot.slane %v2116_v23, 4 }
 0x546   : > { %v2066_v55 = vsel %vm835_vm5, %v2065_v54, %v2048_v62  ;;  %v2067_v0 = vrot.slane %v2048_v62, 4  ;;  %v2080_v5 = vsel %vm835_vm5, %v2064_v46, %v2079_v6  ;;  %v2037_v13 = vmul.f32 %v2016_v8, %v1973_v58  ;;  %v2026_v20 = vpop.permute.xlu1 %2025 }
 0x547   : > { %v2072_v14 = vperm.slane %v2066_v55, %v3823_v61  ;;  %v2088_v16 = vperm.slane %v2080_v5, %v3823_v61  ;;  %v2093_v18 = vrot.slane %v2084_v4, 4  ;;  %v2039_v22 = vmul.f32 %v2026_v20, %v1975_v53 }
 0x548   : > { %v2068_v25 = vsel %vm835_vm5, %v2060_v12, %v2067_v0  ;;  %v2099_v27 = vrot.slane %v2037_v13, 4 }
 0x549   : > { %v2076_v29 = vperm.slane %v2068_v25, %v3823_v61  ;;  %v2089_v10 = vrot.slane %v2072_v14, 4  ;;  %v2094_v30 = vsel %vm835_vm5, 0.0, %v2093_v18  ;;  %v2097_v31 = vrot.slane %v2039_v22, 4 }
 0x54a   : > { %v2100_v33 = vsel %vm835_vm5, %v2039_v22, %v2099_v27  ;;  %v2095_v19 = vrot.slane %v2088_v16, 4  ;;  %v2209_v38 = vrot.slane %v2094_v30, 4 }
 0x54b   : > { %v2090_v34 = vsel %vm835_vm5, 0.0, %v2089_v10  ;;  %v2091_v21 = vrot.slane %v2076_v29, 4  ;;  %v2098_v7 = vsel %vm835_vm5, %v2097_v31, %v2037_v13  ;;  %v2108_v35 = vperm.slane %v2100_v33, %v3815_v51 }
 0x54c   : > { %v2104_v37 = vperm.slane %v2098_v7, %v3815_v51  ;;  %v2096_v15 = vsel %vm835_vm5, 0.0, %v2095_v19  ;;  %v2153_v40 = vrot.slane %v2090_v34, 4  ;;  %v2210_v49 = vsel %vm835_vm5, %v2209_v38, %v2084_v4 }
 0x54d   : > { %v2092_v39 = vsel %vm835_vm5, 0.0, %v2091_v21  ;;  %v2134_v41 = vsel %vm835_vm5, %v2133_v32, %v2108_v35  ;;  %v2135_v9 = vrot.slane %v2108_v35, 4  ;;  %v2221_v47 = vrot.slane %v2096_v15, 4 }
 0x54e   : > { %v2165_v42 = vrot.slane %v2092_v39, 4  ;;  %v2122_v17 = vsel %vm835_vm5, %v2121_v36, %v2104_v37  ;;  %v2123_v44 = vrot.slane %v2104_v37, 4  ;;  %v2140_v45 = vperm.slane %v2134_v41, %v3823_v61 }
 0x54f   : > { %v2128_v11 = vperm.slane %v2122_v17, %v3823_v61  ;;  %v2136_v46 = vsel %vm835_vm5, %v2120_v2, %v2135_v9  ;;  %v2154_v28 = vsel %vm835_vm5, %v2153_v40, %v2072_v14  ;;  %v2222_v54 = vsel %vm835_vm5, %v2221_v47, %v2088_v16 }
 0x550   : > { %v2124_v24 = vsel %vm835_vm5, %v2116_v23, %v2123_v44  ;;  %v2144_v12 = vperm.slane %v2136_v46, %v3823_v61  ;;  %v2149_v48 = vrot.slane %v2140_v45, 4  ;;  %v2166_v56 = vsel %vm835_vm5, %v2165_v42, %v2076_v29 }
 0x551   : > { %v2132_v43 = vperm.slane %v2124_v24, %v3823_v61  ;;  %v2145_v50 = vrot.slane %v2128_v11, 4  ;;  %v2214_v1 = vperm.slane %v2210_v49, %v3815_v51  ;;  %v2158_v62 = vperm.slane %v2154_v28, %v3815_v51 }
 0x552   : > { %v2150_v26 = vsel %vm835_vm5, 0.0, %v2149_v48  ;;  %v2151_v52 = vrot.slane %v2144_v12, 4  ;;  %v2170_v2 = vperm.slane %v2166_v56, %v3815_v51  ;;  %v2226_v8 = vperm.slane %v2222_v54, %v3815_v51  ;;  %v2298_v56 = vld [vmem:[#allocation14 + $0x8] sm:$0xff] }
 0x553   : > { %v2215_v57 = vrot.slane %v2150_v26, 4  ;;  %v2146_v60 = vsel %vm835_vm5, 0.0, %v2145_v50  ;;  %v2147_v63 = vrot.slane %v2132_v43, 4  ;;  %v2179_v18 = vrot.slane %v2158_v62, 4 }
 0x554   : > { %v2152_v58 = vsel %vm835_vm5, 0.0, %v2151_v52  ;;  %v2159_v3 = vrot.slane %v2146_v60, 4  ;;  %v2191_v23 = vrot.slane %v2170_v2, 4  ;;  %v2235_v27 = vrot.slane %v2214_v1, 4  ;;  %v2299_v52 = vld [vmem:[#allocation14 + $0x10] sm:$0xff] }
 0x555   : > { %v2216_v6 = vsel %vm835_vm5, %v2215_v57, %v2140_v45  ;;  %v2227_v53 = vrot.slane %v2152_v58, 4  ;;  %v2148_v59 = vsel %vm835_vm5, 0.0, %v2147_v63  ;;  %v2247_v31 = vrot.slane %v2226_v8, 4  ;;  %v2297_v57 = vld [vmem:[#allocation14] sm:$0xff] }
 0x556   : > { %v2220_v4 = vperm.slane %v2216_v6, %v3815_v51  ;;  %v2160_v55 = vsel %vm835_vm5, %v2159_v3, %v2128_v11  ;;  %v2171_v0 = vrot.slane %v2148_v59, 4 }
 0x557   : > { %v2228_v5 = vsel %vm835_vm5, %v2227_v53, %v2144_v12  ;;  %v2164_v13 = vperm.slane %v2160_v55, %v3815_v51  ;;  %v2334_v55 = vld [vmem:[%s3624_s7 + $0x8] sm:$0x3] }
 0x558   : > { %v2232_v20 = vperm.slane %v2228_v5, %v3815_v51  ;;  %v2233_v14 = vrot.slane %v2220_v4, 4  ;;  %v2172_v16 = vsel %vm835_vm5, %v2171_v0, %v2132_v43  ;;  %v2236_v35 = vsel %vm835_vm5, %v2220_v4, %v2235_v27  ;;  %v2331_v5 = vld [vmem:[%s3624_s7 + $0x2] sm:$0x3]  ;;  %v2336_v27 = vld [vmem:[%s3624_s7 + $0xc] sm:$0x3] }
 0x559   : > { %v2176_v22 = vperm.slane %v2172_v16, %v3815_v51  ;;  %v2177_v25 = vrot.slane %v2164_v13, 4  ;;  %v2180_v30 = vsel %vm835_vm5, %v2164_v13, %v2179_v18  ;;  %v2244_v17 = vperm.slane %v2236_v35, %v3823_v61  ;;  %v2332_v13 = vld [vmem:[%s3624_s7 + $0x4] sm:$0x3] }
 0x55a   : > { %v2234_v29 = vsel %vm835_vm5, %v2233_v14, %v2214_v1  ;;  %v2245_v10 = vrot.slane %v2232_v20, 4  ;;  %v2248_v15 = vsel %vm835_vm5, %v2232_v20, %v2247_v31  ;;  %v2188_v39 = vperm.slane %v2180_v30, %v3823_v61  ;;  %v2333_v20 = vld [vmem:[%s3624_s7 + $0x6] sm:$0x3] }
 0x55b   : > { %v2240_v32 = vperm.slane %v2234_v29, %v3823_v61  ;;  %v2192_v33 = vsel %vm835_vm5, %v2176_v22, %v2191_v23  ;;  %v2178_v19 = vsel %vm835_vm5, %v2177_v25, %v2158_v62  ;;  %v2189_v34 = vrot.slane %v2176_v22, 4  ;;  %v2335_v25 = vld [vmem:[%s3624_s7 + $0xa] sm:$0x3] }
 0x55c   : > { %v2246_v21 = vsel %vm835_vm5, %v2245_v10, %v2226_v8  ;;  %v2200_v51 = vperm.slane %v2192_v33, %v3823_v61  ;;  %v2184_v7 = vperm.slane %v2178_v19, %v3823_v61  ;;  %v2256_v46 = vperm.slane %v2248_v15, %v3823_v61  ;;  %v2330_v8 = vld [vmem:[%s3624_s7] sm:$0x3] }
 0x55d   : > { %v2252_v36 = vperm.slane %v2246_v21, %v3823_v61  ;;  %v2259_v38 = vrot.slane %v2240_v32, 4  ;;  %v2190_v37 = vsel %vm835_vm5, %v2189_v34, %v2170_v2  ;;  %v2207_v48 = vrot.slane %v2188_v39, 4  ;;  %v2337_v34 = vld [vmem:[%s3624_s7 + $0xe] sm:$0x3]  ;;  %s4430_s7 = sld [smem:[#allocation30_spill]] }
 0x55e   : > { %v2205_v40 = vrot.slane %v2200_v51, 4  ;;  %v2196_v41 = vperm.slane %v2190_v37, %v3823_v61  ;;  %v2203_v9 = vrot.slane %v2184_v7, 4  ;;  %v2263_v49 = vrot.slane %v2244_v17, 4  ;;  %v2300_v61 = vld [vmem:[#allocation14 + $0x18] sm:$0xff] }
 0x55f   : > { %v2260_v42 = vsel %vm835_vm5, %v2252_v36, %v2259_v38  ;;  %v2257_v44 = vrot.slane %v2252_v36, 4  ;;  %v2261_v43 = vrot.slane %v2256_v46, 4  ;;  %v2208_v50 = vsel %vm835_vm5, %v2200_v51, %v2207_v48  ;;  %2319 = vmatpush.msra.mxu0 %v2300_v61  ;;  %2827 = vmatpush.msra.mxu1 %v2300_v61 }
 0x560   : > { %2269 = vrot.lane.b32.xlu0 %v2260_v42, %s3388_s30  ;;  %v2206_v45 = vsel %vm835_vm5, %v2205_v40, %v2188_v39  ;;  %v2204_v11 = vsel %vm835_vm5, %v2196_v41, %v2203_v9  ;;  %v2201_v47 = vrot.slane %v2196_v41, 4  ;;  %v2264_v28 = vsel %vm835_vm5, %v2256_v46, %v2263_v49 }
 0x561   : > { %2275 = vrot.lane.b32.xlu1 %v2206_v45, %s3389_s15  ;;  %2267 = vrot.lane.b32.xlu2 %v2204_v11, %s3388_s30  ;;  %v2258_v24 = vsel %vm835_vm5, %v2257_v44, %v2240_v32  ;;  %v2262_v26 = vsel %vm835_vm5, %v2261_v43, %v2244_v17  ;;  %v3391_v15 = vmov 32.0   ;;  %v3392_v17 = vmov 269488144  }
 0x562   : > { %v2202_v12 = vsel %vm835_vm5, %v2201_v47, %v2184_v7  ;;  %2320 = vmatpush.msra.mxu0 %v2299_v52  ;;  %2828 = vmatpush.msra.mxu1 %v2299_v52  ;;  %3074 = vrcp.f32 %v3391_v15  ;;  %v2405_v44 = vunpack.c.l.s4 %v3392_v17  ;;  %v3393_v45 = vmov 842150450  }
 0x563   : > { %v2409_v11 = vunpack.c.l.s4 %v3393_v45  ;;  %v3394_v46 = vmov 1414812756   ;;  %v3056_v15 = vld [vmem:[%s4430_s7] ss:$0 sm:$0xff] }
 0x564   : > { %2321 = vmatpush.msra.mxu0 %v2298_v56  ;;  %2829 = vmatpush.msra.mxu1 %v2298_v56  ;;  %v2413_v47 = vunpack.c.l.s4 %v3394_v46  ;;  %v4245_v49 = vunpack.c.0.s8 %v2405_v44  ;;  %v2571_v17 = vrot.slane %v3056_v15, 2  ;;  %v2572_v44 = vrot.slane %v3056_v15, 4 }
 0x565   : > { %v4247_v43 = vunpack.c.0.s8 %v2409_v11  ;;  %v2573_v11 = vrot.slane %v3056_v15, 6 }
 0x566   : > { %2322 = vmatpush.msra.mxu0 %v2297_v57  ;;  %2830 = vmatpush.msra.mxu1 %v2297_v57 }
 0x568   : > { %2283 = vrot.lane.b32.xlu0 %v2208_v50, %s3390_s20  ;;  %v3075_v39 = vpop.eup %3074  ;;  %v4249_v50 = vunpack.c.0.s8 %v2413_v47 }
 0x569   : > { %2285 = vrot.lane.b32.xlu1 %v2264_v28, %s3390_s20  ;;  %2277 = vrot.lane.b32.xlu2 %v2262_v26, %s3389_s15  ;;  %v2394_v40 = vmul.f32 32.0, %v3075_v39  ;;  %vm2398_vm10 = vweird.f32 %v3075_v39 }
 0x56b   : > { %v2395_v41 = vsub.f32 1.0, %v2394_v40  ;;  %v3057_v40 = vld [vmem:[%s4431_s18] ss:$0 sm:$0xff] }
 0x56c   : > { %v2589_v46 = vrot.slane %v3057_v40, 2  ;;  %v2590_v47 = vrot.slane %v3057_v40, 4 }
 0x56d   : > { %v2396_v9 = vmul.f32 %v3075_v39, %v2395_v41 }
 0x56f   : > { %v2397_v42 = vadd.f32 %v3075_v39, %v2396_v9 }
 0x571   : > { %v2399_v48 = vsel %vm2398_vm10, %v3075_v39, %v2397_v42 }
 0x5bb   : > { %v2268_v54 = vpop.permute.xlu2 %2267 }
 0x5bc   : > { %v2289_v58 = vsel %vm1307_vm6, %v2202_v12, %v2268_v54 }
 0x5c3   : > { %v2278_v62 = vpop.permute.xlu2 %2277 }
 0x5d2   : > { %v2270_v60 = vpop.permute.xlu0 %2269 }
 0x5d3   : > { %v2276_v63 = vpop.permute.xlu1 %2275  ;;  %v2290_v1 = vsel %vm1307_vm6, %v2258_v24, %v2270_v60  ;;  %v3395_v24 = vmov 1987475062  }
 0x5d4   : > { %v2292_v3 = vsel %vm2291_vm8, %v2289_v58, %v2276_v63  ;;  %v2293_v2 = vsel %vm2291_vm8, %v2290_v1, %v2278_v62  ;;  %v2417_v12 = vunpack.c.l.s4 %v3395_v24 }
 0x5d6   : > { %v4251_v28 = vunpack.c.0.s8 %v2417_v12 }
 0x5da   : > { %v2284_v6 = vpop.permute.xlu0 %2283 }
 0x5db   : > { %v2286_v53 = vpop.permute.xlu1 %2285  ;;  %v2295_v59 = vsel %vm2294_vm9, %v2292_v3, %v2284_v6 }
 0x5dc   : > { %2813 = vmatmul.msk.f32.vlgmr.msra.gmra.mxu0 %vm786_vm4, %v2295_v59  ;;  %v2296_v4 = vsel %vm2294_vm9, %v2293_v2, %v2286_v53 }
 0x5dd   : > { %2814 = vmatmul.msk.f32.vlgmr.msra.gmra.mxu1 %vm786_vm4, %v2296_v4 }
 0x659   : > { %v2324_v0 = vpop.f32.mrf.mxu0 }
 0x65a   : > { %v2340_v14 = vrot.slane %v2324_v0, 2  ;;  %v2341_v16 = vrot.slane %v2324_v0, 4  ;;  %v2342_v18 = vrot.slane %v2324_v0, 6  ;;  %v2352_v22 = vadd.f32 %v2330_v8, %v2324_v0  ;;  %v2327_v23 = vpop.f32.mrf.mxu1 }
 0x65b   : > { %v2343_v29 = vrot.slane %v2327_v23, 2  ;;  %v2344_v10 = vrot.slane %v2327_v23, 4  ;;  %v2345_v30 = vrot.slane %v2327_v23, 6  ;;  %v2356_v31 = vadd.f32 %v2334_v55, %v2327_v23 }
 0x65c   : > { %v2353_v32 = vadd.f32 %v2340_v14, %v2331_v5  ;;  %v2354_v33 = vadd.f32 %v2341_v16, %v2332_v13  ;;  %v2355_v19 = vadd.f32 %v2342_v18, %v2333_v20  ;;  %2368 = vst [vmem:[#allocation1] ss:$4 sm:$0xff] %v2352_v22 }
 0x65d   : > { %v2357_v21 = vadd.f32 %v2343_v29, %v2335_v25  ;;  %2376 = vst [vmem:[#allocation1 + $0x20] ss:$4 sm:$0xff] %v2356_v31  ;;  %v2358_v51 = vadd.f32 %v2344_v10, %v2336_v27  ;;  %v2359_v7 = vadd.f32 %v2345_v30, %v2337_v34 }
 0x65e   : > { %2370 = vst [vmem:[#allocation1 + $0x1] ss:$4 sm:$0xff] %v2353_v32 }
 0x65f   : > { %2372 = vst [vmem:[#allocation1 + $0x2] ss:$4 sm:$0xff] %v2354_v33 }
 0x660   : > { %2374 = vst [vmem:[#allocation1 + $0x3] ss:$4 sm:$0xff] %v2355_v19 }
 0x661   : > { %2378 = vst [vmem:[#allocation1 + $0x21] ss:$4 sm:$0xff] %v2357_v21 }
 0x662   : > { %2380 = vst [vmem:[#allocation1 + $0x22] ss:$4 sm:$0xff] %v2358_v51 }
 0x663   : > { %2382 = vst [vmem:[#allocation1 + $0x23] ss:$4 sm:$0xff] %v2359_v7 }
 0x667   : > { %v2383_v35 = vld.sshfl [vmem:[#allocation1] sm:$0xff pattern:$0x73625140] }
 0x668   : > { %v2387_v36 = vsel %vm786_vm4, %v2383_v35, 0.0 }
 0x669   : > { %2388 = vadd.xlane.f32.xlu2 %v2387_v36 }
 0x66a   : > { %v2384_v38 = vld.sshfl [vmem:[#allocation1 + $0x20] sm:$0xff pattern:$0x73625140] }
 0x66b   : > { %v2390_v37 = vsel %vm786_vm4, %v2384_v38, 0.0 }
 0x66c   : > { %2391 = vadd.xlane.f32.xlu0 %v2390_v37 }
 0x6dc   : > { %v2389_v26 = vpop.xlane.xlu2 %2388 }
 0x6dd   : > { %v2400_v61 = vmul.f32 %v2399_v48, %v2389_v26 }
 0x6df   : > { %v2392_v52 = vpop.xlane.xlu0 %2391  ;;  %v2407_v56 = vperm.slane %v2400_v61, %v4245_v49  ;;  %v2411_v57 = vperm.slane %v2400_v61, %v4247_v43  ;;  %v2415_v54 = vperm.slane %v2400_v61, %v4249_v50  ;;  %v2419_v60 = vperm.slane %v2400_v61, %v4251_v28 }
 0x6e0   : > { %v2401_v63 = vmul.f32 %v2399_v48, %v2392_v52 }
 0x6e1   : > { %v4257_v1 = vsub.f32 %v2352_v22, %v2407_v56  ;;  %v4259_v58 = vsub.f32 %v2353_v32, %v2411_v57  ;;  %v4261_v62 = vsub.f32 %v2354_v33, %v2415_v54  ;;  %v4267_v2 = vsub.f32 %v2355_v19, %v2419_v60 }
 0x6e2   : > { %v2423_v3 = vperm.slane %v2401_v63, %v4245_v49  ;;  %v2427_v6 = vperm.slane %v2401_v63, %v4247_v43  ;;  %v2431_v53 = vperm.slane %v2401_v63, %v4249_v50  ;;  %v2435_v59 = vperm.slane %v2401_v63, %v4251_v28 }
 0x6e3   : > { %v2452_v4 = vmul.f32 %v4257_v1, %v4257_v1  ;;  %v2453_v8 = vmul.f32 %v4259_v58, %v4259_v58  ;;  %v2454_v55 = vmul.f32 %v4261_v62, %v4261_v62  ;;  %v2455_v23 = vmul.f32 %v4267_v2, %v4267_v2 }
 0x6e4   : > { %v4275_v0 = vsub.f32 %v2356_v31, %v2423_v3  ;;  %v4277_v5 = vsub.f32 %v2357_v21, %v2427_v6  ;;  %v4279_v13 = vsub.f32 %v2358_v51, %v2431_v53  ;;  %v4281_v20 = vsub.f32 %v2359_v7, %v2435_v59 }
 0x6e5   : > { %2468 = vst [vmem:[#allocation1] ss:$4 sm:$0xff] %v2452_v4 }
 0x6e6   : > { %v2456_v14 = vmul.f32 %v4275_v0, %v4275_v0  ;;  %v2457_v16 = vmul.f32 %v4277_v5, %v4277_v5  ;;  %v2458_v18 = vmul.f32 %v4279_v13, %v4279_v13  ;;  %2470 = vst [vmem:[#allocation1 + $0x1] ss:$4 sm:$0xff] %v2453_v8  ;;  %v2459_v22 = vmul.f32 %v4281_v20, %v4281_v20 }
 0x6e7   : > { %2472 = vst [vmem:[#allocation1 + $0x2] ss:$4 sm:$0xff] %v2454_v55 }
 0x6e8   : > { %2476 = vst [vmem:[#allocation1 + $0x20] ss:$4 sm:$0xff] %v2456_v14 }
 0x6e9   : > { %2478 = vst [vmem:[#allocation1 + $0x21] ss:$4 sm:$0xff] %v2457_v16 }
 0x6ea   : > { %2480 = vst [vmem:[#allocation1 + $0x22] ss:$4 sm:$0xff] %v2458_v18 }
 0x6eb   : > { %2482 = vst [vmem:[#allocation1 + $0x23] ss:$4 sm:$0xff] %v2459_v22 }
 0x6ec   : > { %2474 = vst [vmem:[#allocation1 + $0x3] ss:$4 sm:$0xff] %v2455_v23 }
 0x6f2   : > { %v2484_v25 = vld.sshfl [vmem:[#allocation1 + $0x20] sm:$0xff pattern:$0x73625140] }
 0x6f3   : > { %v2490_v27 = vsel %vm786_vm4, %v2484_v25, 0.0  ;;  %v2483_v29 = vld.sshfl [vmem:[#allocation1] sm:$0xff pattern:$0x73625140] }
 0x6f4   : > { %2491 = vadd.xlane.f32.xlu2 %v2490_v27  ;;  %v2487_v10 = vsel %vm786_vm4, %v2483_v29, 0.0 }
 0x6f5   : > { %2488 = vadd.xlane.f32.xlu1 %v2487_v10 }
 0x767   : > { %v2492_v30 = vpop.xlane.xlu2 %2491 }
 0x768   : > { %v2489_v31 = vpop.xlane.xlu1 %2488  ;;  %v2494_v32 = vmul.f32 %v2492_v30, %v2399_v48 }
 0x769   : > { %v2493_v33 = vmul.f32 %v2489_v31, %v2399_v48 }
 0x76a   : > { %v2496_v19 = vadd.f32 1e-05, %v2494_v32 }
 0x76b   : > { %v2495_v34 = vadd.f32 1e-05, %v2493_v33 }
 0x76c   : > { %3076 = vrsqrt.f32 %v2496_v19  ;;  %vm2513_vm14 = vweird.f32 %v2496_v19 }
 0x76d   : > { %3078 = vrsqrt.f32 %v2495_v34  ;;  %vm2503_vm15 = vweird.f32 %v2495_v34 }
 0x772   : > { %v3077_v21 = vpop.eup %3076 }
 0x773   : > { %v3079_v51 = vpop.eup %3078  ;;  %v2508_v7 = vmul.f32 %v3077_v21, %v2496_v19  ;;  %vm2514_vm11 = vweird.f32 %v3077_v21 }
 0x774   : > { %v2498_v35 = vmul.f32 %v3079_v51, %v2495_v34  ;;  %vm2504_vm12 = vweird.f32 %v3079_v51  ;;  %vm2515_vm0 = vmor %vm2513_vm14, %vm2514_vm11 }
 0x775   : > { %v2509_v36 = vmul.f32 %v3077_v21, %v2508_v7  ;;  %vm2505_vm1 = vmor %vm2503_vm15, %vm2504_vm12 }
 0x776   : > { %v2499_v38 = vmul.f32 %v3079_v51, %v2498_v35 }
 0x777   : > { %v2510_v37 = vmul.f32 0.5, %v2509_v36 }
 0x778   : > { %v2500_v39 = vmul.f32 0.5, %v2499_v38 }
 0x779   : > { %v2511_v41 = vsub.f32 1.5, %v2510_v37 }
 0x77a   : > { %v2501_v9 = vsub.f32 1.5, %v2500_v39 }
 0x77b   : > { %v2512_v42 = vmul.f32 %v3077_v21, %v2511_v41 }
 0x77c   : > { %v2502_v45 = vmul.f32 %v3079_v51, %v2501_v9 }
 0x77d   : > { %v2516_v24 = vsel %vm2515_vm0, %v3077_v21, %v2512_v42 }
 0x77e   : > { %v2506_v12 = vsel %vm2505_vm1, %v3079_v51, %v2502_v45  ;;  %v2538_v48 = vperm.slane %v2516_v24, %v4245_v49  ;;  %v2542_v26 = vperm.slane %v2516_v24, %v4247_v43  ;;  %v2546_v61 = vperm.slane %v2516_v24, %v4249_v50 }
 0x77f   : > { %v2522_v52 = vperm.slane %v2506_v12, %v4245_v49  ;;  %v2526_v56 = vperm.slane %v2506_v12, %v4247_v43  ;;  %v2530_v57 = vperm.slane %v2506_v12, %v4249_v50  ;;  %v2534_v54 = vperm.slane %v2506_v12, %v4251_v28 }
 0x780   : > { %v2550_v60 = vperm.slane %v2516_v24, %v4251_v28  ;;  %v2563_v63 = vmul.f32 %v2538_v48, %v4275_v0  ;;  %v2564_v3 = vmul.f32 %v2542_v26, %v4277_v5  ;;  %v2565_v6 = vmul.f32 %v2546_v61, %v4279_v13 }
 0x781   : > { %v2559_v53 = vmul.f32 %v2522_v52, %v4257_v1  ;;  %v2560_v59 = vmul.f32 %v2526_v56, %v4259_v58  ;;  %v2561_v49 = vmul.f32 %v2530_v57, %v4261_v62  ;;  %v2562_v43 = vmul.f32 %v2534_v54, %v4267_v2 }
 0x782   : > { %v2591_v50 = vrot.slane %v3057_v40, 6  ;;  %v2566_v4 = vmul.f32 %v2550_v60, %v4281_v20  ;;  %v2581_v28 = vmul.f32 %v3056_v15, %v2563_v63  ;;  %v2582_v8 = vmul.f32 %v2571_v17, %v2564_v3 }
 0x783   : > { %v2577_v55 = vmul.f32 %v3056_v15, %v2559_v53  ;;  %v2578_v0 = vmul.f32 %v2571_v17, %v2560_v59  ;;  %v2579_v5 = vmul.f32 %v2572_v44, %v2561_v49  ;;  %v2580_v1 = vmul.f32 %v2573_v11, %v2562_v43 }
 0x784   : > { %v2583_v58 = vmul.f32 %v2572_v44, %v2565_v6  ;;  %v2599_v62 = vadd.f32 %v3057_v40, %v2581_v28  ;;  %v2584_v16 = vmul.f32 %v2573_v11, %v2566_v4  ;;  %v2600_v20 = vadd.f32 %v2589_v46, %v2582_v8 }
 0x785   : > { %v2595_v2 = vadd.f32 %v3057_v40, %v2577_v55  ;;  %v2596_v13 = vadd.f32 %v2589_v46, %v2578_v0  ;;  %v2597_v14 = vadd.f32 %v2590_v47, %v2579_v5  ;;  %v2598_v18 = vadd.f32 %v2591_v50, %v2580_v1 }
 0x786   : > { %2608 = vst.msk [vmem:[%s3646_s3 + $0x8] sm:$0x3] %vm2603_vm13, %v2599_v62  ;;  %v2601_v22 = vadd.f32 %v2590_v47, %v2583_v58  ;;  %v2602_v23 = vadd.f32 %v2591_v50, %v2584_v16 }
 0x787   : > { %2604 = vst.msk [vmem:[%s3646_s3] sm:$0x3] %vm2603_vm13, %v2595_v2 }
 0x788   : > { %2605 = vst.msk [vmem:[%s3646_s3 + $0x2] sm:$0x3] %vm2603_vm13, %v2596_v13 }
 0x789   : > { %2606 = vst.msk [vmem:[%s3646_s3 + $0x4] sm:$0x3] %vm2603_vm13, %v2597_v14 }
 0x78a   : > { %2607 = vst.msk [vmem:[%s3646_s3 + $0x6] sm:$0x3] %vm2603_vm13, %v2598_v18 }
 0x78b   : > { %2609 = vst.msk [vmem:[%s3646_s3 + $0xa] sm:$0x3] %vm2603_vm13, %v2600_v20 }
 0x78c   : > { %2610 = vst.msk [vmem:[%s3646_s3 + $0xc] sm:$0x3] %vm2603_vm13, %v2601_v22 }
 0x78d   : > { %2611 = vst.msk [vmem:[%s3646_s3 + $0xe] sm:$0x3] %vm2603_vm13, %v2602_v23 }
 0x78e PF: > { %s4432_s23 = sld [smem:[#allocation22_spill]]  ;;  %s2625_s17 = sshll.u32 %s3646_s3, 4  ;;  %s2626_s17 = int_to_ptr.vmem [resolvable:$true] %s2625_s17 }
 0x78f   : > { %s4434_s4 = sld [smem:[#allocation32_spill]]  ;;  %s2613_s30 = scalar_lea.sflag [#allocation8], %s3620_s27 }
 0x794   : > { %s2822_s12 = sshll.u32 %s4432_s23, 4 }
 0x795   : > { %s2624_s22 = scalar_lea.hbm %s4434_s4, %s2822_s12  ;;  %s3250_s7 = scalar_lea.hbm %s4434_s4, 32 }
 0x796   : > { %s2627_s24 = sshll.u32 %s2624_s22, 4  ;;  %s2628_s24 = int_to_ptr.hbm [resolvable:$true] %s2627_s24 }
 0x797   : > { %s3244_s15 = sshra.s32 %s2628_s24, 4  ;;  %s3245_s15 = int_to_ptr.hbm [resolvable:$true] %s3244_s15 }
 0x798   : > { %s3246_s20 = scalar_lea.hbm %s3245_s15, 16  ;;  %p3251_p8 = scmp.lt.s32.totalorder %s3245_s15, %s4434_s4 }
 0x799   : > { %p3247_p5 = scmp.ne.s32.totalorder %s3245_s15, %s3246_s20  ;;  %p3252_p9 = scmp.lt.s32.totalorder %s3250_s7, %s3246_s20 }
 0x79b   : > { %p3248_p3 = pnand %p3247_p5, %p3542_p12  ;;  %p3253_p11 = por %p3252_p9, %p3251_p8 }
 0x79d   : > { %p3249_p2 = pneg %p3248_p3 }
 0x79f   : > { %p3254_p13 = pnand %p3253_p11, %p3249_p2 }
 0x7a1   : > { %3257 = shalt.err (!%p3254_p13)
}
 0x7a2   : > { %s3396_s27 = smov 32   ;;  %s3397_s3 = smov 2  }
 0x7a3   : > { %2847 = dma.vmem_to_hbm [thread:$0]  (%p3542_p12), %s2626_s17, 256, %s2628_s24, %s2613_s30, %s3396_s27, %s3396_s27, %s3397_s3  }
 0x7a4 PF: > { %s4435_s18 = sld [smem:[#allocation21_spill]]  ;;  %p2877_p0 = scmp.ge.s32.totalorder %s3364_s11, 2 }
 0x7a6   : > { %p2867_p7 = pnand %p2877_p0, %p3558_p4 }
 0x7a8   : > { %p2868_p10 = pneg %p2867_p7 }
 0x7aa   : > { %s2642_s12 = sand.u32 1, %s4435_s18  }
 0x7ab   : > { %s2643_s13 = scalar_lea.sflag [#allocation8], %s2642_s12 }
 0x7ac   : > { %3319 = dma.done.wait (%p2868_p10), %s2643_s13, 256  }
 0x7ad   : > { %3321 = vsyncadd (%p2868_p10), %s2643_s13, 4294967040  ;;  %s27_s11 = sadd.s32 1, %s3364_s11   ;;  %s4437_s16 = sld [smem:[#allocation25_spill]] }
 0x7ae   : > { %p24_p6 = scmp.ge.s32.totalorder %s27_s11, 6   ;;  %s4438_s24 = smov %s3328_s25 }
 0x7af   : > { %s4439_s25 = smov %s3332_s26  ;;  %s4440_s26 = smov %s3597_s19 }
 0x7b0   : > { %s4441_s27 = smov %s3340_s28  ;;  %s4442_s28 = smov %s3344_s29 }
 0x7b1   : > { %s4443_s29 = smov %s3608_s6  ;;  %s4444_s30 = smov %s3356_s9 }
 0x7b2   : > { %s4445_s8 = smov %s3360_s10  ;;  %s4447_s10 = smov %s4453_s2 }
 0x7b3   : > { %s4446_s9 = smov %s4437_s16  ;;  %26 = sbr.rel (!%p24_p6) target bundleno = 20 (0x14), region = 154 }
 0x7b8   :  { %2649 = vsyncpa [#allocation7], 1 }
 0x7b9   :  { %2651 = vsyncpa [#allocation7 + $0x1], 1 }
 0x7ba   :  { %2652 = vsyncpa [#allocation10], 1 }
 0x7bb   :  { %2654 = vsyncpa [#allocation10 + $0x1], 1 }
 0x7bc   :  { %2655 = vsyncpa [#allocation13], 1 }
 0x7bd   :  { %2656 = vsyncpa [#allocation8], 1 }
 0x7be   :  { %2658 = vsyncpa [#allocation8 + $0x1], 1 }

</bundles_post_ra>
